<compile_context>
chip_gen: v5e
topology: v5e:2x2
jax: 0.10.0
libtpu: 0.0.40
codegen_flags: <defaults>
</compile_context>

<pallas_src>
import functools

import jax
import jax.numpy as jnp
from jax.experimental import pallas as pl
from jax.experimental.pallas import tpu as pltpu

NUM_HIDDEN = 8
IN_DIM = 784
MID_DIM = 256


def _round_up(x, m):
    return (x + m - 1) // m * m


def _cdiv(a, b):
    return -(-a // b)


def vae_forward_kernel(
    x_ref, eps_ref,
    w1_ref, b1_ref,       # encoder Linear(784->256): bf16 weight, f32 bias
    w2_ref, b2_ref,       # encoder Linear(256->8)
    wmv_ref, bmv_ref,     # fused [mu | log_var] Linear(8->16)
    w3_ref, b3_ref,       # decoder Linear(8->256)
    w4_ref, b4_ref,       # decoder Linear(256->784)
    small_ref, dec_ref,   # outputs: packed [enc|mu|log_var] (tb,24) f32, decoded (tb,784) bf16
):
    bf16 = jnp.bfloat16
    x = x_ref[...].astype(bf16)          # cast in-kernel; x arrives as native f32

    # ---- encoder: Linear -> ReLU -> Linear -> ReLU ----
    h1 = jnp.dot(x, w1_ref[...], preferred_element_type=jnp.float32) + b1_ref[...]
    h1 = jnp.maximum(h1, 0.0)
    enc = jnp.dot(h1.astype(bf16), w2_ref[...],
                  preferred_element_type=jnp.float32) + b2_ref[...]
    enc = jnp.maximum(enc, 0.0)

    # ---- fused mu / log_var heads (single tiny MXU push) ----
    mulv = jnp.dot(enc.astype(bf16), wmv_ref[...],
                   preferred_element_type=jnp.float32) + bmv_ref[...]
    mu = mulv[:, :NUM_HIDDEN]
    lv = mulv[:, NUM_HIDDEN:]

    # ---- reparameterize: z = mu + eps * exp(0.5 * log_var) ----
    z = mu + eps_ref[...] * jnp.exp(0.5 * lv)

    # ---- decoder: Linear -> ReLU -> Linear -> Sigmoid ----
    h3 = jnp.dot(z.astype(bf16), w3_ref[...],
                 preferred_element_type=jnp.float32) + b3_ref[...]
    h3 = jnp.maximum(h3, 0.0)
    logits = jnp.dot(h3.astype(bf16), w4_ref[...],
                     preferred_element_type=jnp.float32) + b4_ref[...]
    # f32 sigmoid (portable to v5e), bf16 store (halves decoder writeback bytes).
    dec_ref[...] = jax.nn.sigmoid(logits).astype(dec_ref.dtype)

    # One packed store for the three 8-wide heads instead of three masked stores.
    small_ref[...] = jnp.concatenate([enc, mu, lv], axis=-1)


def pack_params(params):
    """One-time parameter packing (bf16 matmul operands, fused mu/log_var head).

    Call this ONCE (outside the per-step path); pass the result to vae_forward so
    the ~1.5 MB of cast/concat ops are not serialized in front of every kernel call.
    """
    (w1, b1, w2, b2, wmu, bmu, wlv, blv, w3, b3, w4, b4) = params
    bf16 = jnp.bfloat16
    return dict(
        w1=w1.astype(bf16), b1=b1,
        w2=w2.astype(bf16), b2=b2,
        wmv=jnp.concatenate([wmu, wlv], axis=1).astype(bf16),
        bmv=jnp.concatenate([bmu, blv], axis=1),
        w3=w3.astype(bf16), b3=b3,
        w4=w4.astype(bf16), b4=b4,
    )


def vae_forward(x, eps, packed, *, tile_b=None):
    """Returns (encoded, decoded, mu, log_var), matching the PyTorch VAE.forward.

    `decoded` is returned in bfloat16 (bandwidth-bound kernel; halves the dominant
    writeback).  Cast to f32 outside if exact f32 storage is required.
    """
    B = x.shape[0]
    Bp8 = _round_up(B, 8)

    if tile_b is None:
        # >= 2 tiles whenever possible (v7x: 2 TensorCores share the "parallel"
        # batch axis), <= 1024 rows per tile, sized relative to B to cap padding.
        n_tiles = 1 if Bp8 < 16 else max(2, _cdiv(Bp8, 1024))
        tile_b = _cdiv(Bp8, n_tiles)
    tile_b = max(16, _round_up(tile_b, 16))   # bf16-friendly sublane multiple
    Bp = _round_up(B, tile_b)

    # Only pad batch rows when strictly needed (avoids an HBM copy of x / eps).
    if Bp != B:
        x_in = jnp.pad(x, ((0, Bp - B), (0, 0)))
        eps_in = jnp.pad(eps, ((0, Bp - B), (0, 0)))
    else:
        x_in, eps_in = x, eps

    def w_spec(shape):
        # Weight/bias blocks: whole array, same block every grid step -> VMEM-resident.
        return pl.BlockSpec(shape, lambda i: (0, 0))

    out_shapes = (
        jax.ShapeDtypeStruct((Bp, 3 * NUM_HIDDEN), jnp.float32),   # [enc | mu | lv]
        jax.ShapeDtypeStruct((Bp, IN_DIM), jnp.bfloat16),          # decoded
    )

    small, dec = pl.pallas_call(
        vae_forward_kernel,
        out_shape=out_shapes,
        grid=(Bp // tile_b,),
        in_specs=[
            pl.BlockSpec((tile_b, IN_DIM), lambda i: (i, 0)),       # x (full-width block)
            pl.BlockSpec((tile_b, NUM_HIDDEN), lambda i: (i, 0)),   # eps
            w_spec((IN_DIM, MID_DIM)), w_spec((1, MID_DIM)),                  # w1, b1
            w_spec((MID_DIM, NUM_HIDDEN)), w_spec((1, NUM_HIDDEN)),           # w2, b2
            w_spec((NUM_HIDDEN, 2 * NUM_HIDDEN)), w_spec((1, 2 * NUM_HIDDEN)),  # wmv, bmv
            w_spec((NUM_HIDDEN, MID_DIM)), w_spec((1, MID_DIM)),              # w3, b3
            w_spec((MID_DIM, IN_DIM)), w_spec((1, IN_DIM)),                   # w4, b4
        ],
        out_specs=(
            pl.BlockSpec((tile_b, 3 * NUM_HIDDEN), lambda i: (i, 0)),
            pl.BlockSpec((tile_b, IN_DIM), lambda i: (i, 0)),
        ),
        compiler_params=pltpu.CompilerParams(
            dimension_semantics=("parallel",),       # independent batch tiles
            vmem_limit_bytes=32 * 1024 * 1024,       # fits tile_b=1024 double-buffered
        ),
    )(x_in, eps_in,
      packed["w1"], packed["b1"], packed["w2"], packed["b2"],
      packed["wmv"], packed["bmv"], packed["w3"], packed["b3"],
      packed["w4"], packed["b4"])

    if Bp != B:          # only slice (and copy) when batch rows were padded
        small = small[:B]
        dec = dec[:B]
    encoded = small[:, :NUM_HIDDEN]
    mu_out = small[:, NUM_HIDDEN:2 * NUM_HIDDEN]
    lv_out = small[:, 2 * NUM_HIDDEN:]
    return encoded, dec, mu_out, lv_out


def _linear_params(key, fan_in, fan_out):
    """PyTorch-style init U(-1/sqrt(fan_in), 1/sqrt(fan_in)); weight pre-transposed
    to (fan_in, fan_out)."""
    kw, kb = jax.random.split(key)
    bound = 1.0 / jnp.sqrt(jnp.float32(fan_in))
    w = jax.random.uniform(kw, (fan_in, fan_out), jnp.float32, -bound, bound)
    b = jax.random.uniform(kb, (1, fan_out), jnp.float32, -bound, bound)
    return w, b


def make_params(key):
    keys = jax.random.split(key, 6)
    w1, b1 = _linear_params(keys[0], IN_DIM, MID_DIM)        # encoder[0]
    w2, b2 = _linear_params(keys[1], MID_DIM, NUM_HIDDEN)    # encoder[2]
    wmu, bmu = _linear_params(keys[2], NUM_HIDDEN, NUM_HIDDEN)
    wlv, blv = _linear_params(keys[3], NUM_HIDDEN, NUM_HIDDEN)
    w3, b3 = _linear_params(keys[4], NUM_HIDDEN, MID_DIM)    # decoder[0]
    w4, b4 = _linear_params(keys[5], MID_DIM, IN_DIM)        # decoder[2]
    return (w1, b1, w2, b2, wmu, bmu, wlv, blv, w3, b3, w4, b4)


def vae_forward_ref(x, eps, params):
    """Pure-JAX f32 reference (same math as the PyTorch module)."""
    w1, b1, w2, b2, wmu, bmu, wlv, blv, w3, b3, w4, b4 = params
    h1 = jax.nn.relu(x @ w1 + b1)
    enc = jax.nn.relu(h1 @ w2 + b2)
    mu = enc @ wmu + bmu
    lv = enc @ wlv + blv
    z = mu + eps * jnp.exp(0.5 * lv)
    h3 = jax.nn.relu(z @ w3 + b3)
    dec = jax.nn.sigmoid(h3 @ w4 + b4)
    return enc, dec, mu, lv


if __name__ == "__main__":
    key = jax.random.PRNGKey(0)
    k_x, k_eps, k_p = jax.random.split(key, 3)

    B = 32                                                         # small batch
    x = jax.random.uniform(k_x, (B, IN_DIM), jnp.float32)          # "image" batch
    eps = jax.random.normal(k_eps, (B, NUM_HIDDEN), jnp.float32)   # reparam noise
    params = make_params(k_p)
    packed = pack_params(params)            # hoisted out of the per-call path

    fwd = jax.jit(vae_forward)              # default tile_b -> 16, grid = (2,)
    encoded, decoded, mu, log_var = jax.block_until_ready(fwd(x, eps, packed))

    assert encoded.shape == (B, NUM_HIDDEN)
    assert decoded.shape == (B, IN_DIM)
    assert decoded.dtype == jnp.bfloat16
    assert mu.shape == (B, NUM_HIDDEN)
    assert log_var.shape == (B, NUM_HIDDEN)
    dec_f32 = decoded.astype(jnp.float32)
    assert bool(jnp.all(jnp.isfinite(dec_f32)))

    # Check against the f32 reference (kernel matmuls are bf16 w/ f32 accumulation,
    # decoded output stored in bf16).
    enc_r, dec_r, mu_r, lv_r = vae_forward_ref(x, eps, params)
    assert float(jnp.max(jnp.abs(encoded - enc_r))) < 5e-2
    assert float(jnp.max(jnp.abs(dec_f32 - dec_r))) < 5e-2
    assert float(jnp.max(jnp.abs(mu - mu_r))) < 5e-2
    assert float(jnp.max(jnp.abs(log_var - lv_r))) < 5e-2

    print("KERNEL_OK")
</pallas_src>

<mosaic_0001>
module attributes {stable_mosaic.version = 11 : i64} {
  func.func @vae_forward_kernel(%arg0: i32, %arg1: memref<16x784xf32, #tpu.memory_space<vmem>>, %arg2: memref<16x8xf32, #tpu.memory_space<vmem>>, %arg3: memref<784x256xbf16, #tpu.memory_space<vmem>>, %arg4: memref<1x256xf32, #tpu.memory_space<vmem>>, %arg5: memref<256x8xbf16, #tpu.memory_space<vmem>>, %arg6: memref<1x8xf32, #tpu.memory_space<vmem>>, %arg7: memref<8x16xbf16, #tpu.memory_space<vmem>>, %arg8: memref<1x16xf32, #tpu.memory_space<vmem>>, %arg9: memref<8x256xbf16, #tpu.memory_space<vmem>>, %arg10: memref<1x256xf32, #tpu.memory_space<vmem>>, %arg11: memref<256x784xbf16, #tpu.memory_space<vmem>>, %arg12: memref<1x784xf32, #tpu.memory_space<vmem>>, %arg13: memref<16x24xf32, #tpu.memory_space<vmem>>, %arg14: memref<16x784xbf16, #tpu.memory_space<vmem>>) attributes {dimension_semantics = [#tpu.dimension_semantics<parallel>], iteration_bounds = array<i64: 2>, scalar_prefetch = 0 : i64, scratch_operands = 0 : i64, tpu.core_type = #tpu.core_type<tc>, window_params = [{transform_indices = @transform_0, window_bounds = array<i64: 16, 784>}, {transform_indices = @transform_1, window_bounds = array<i64: 16, 8>}, {pipeline_mode = #tpu.pipeline_mode<synchronous>, transform_indices = @transform_2, window_bounds = array<i64: 784, 256>}, {pipeline_mode = #tpu.pipeline_mode<synchronous>, transform_indices = @transform_3, window_bounds = array<i64: 1, 256>}, {pipeline_mode = #tpu.pipeline_mode<synchronous>, transform_indices = @transform_4, window_bounds = array<i64: 256, 8>}, {pipeline_mode = #tpu.pipeline_mode<synchronous>, transform_indices = @transform_5, window_bounds = array<i64: 1, 8>}, {pipeline_mode = #tpu.pipeline_mode<synchronous>, transform_indices = @transform_6, window_bounds = array<i64: 8, 16>}, {pipeline_mode = #tpu.pipeline_mode<synchronous>, transform_indices = @transform_7, window_bounds = array<i64: 1, 16>}, {pipeline_mode = #tpu.pipeline_mode<synchronous>, transform_indices = @transform_8, window_bounds = array<i64: 8, 256>}, {pipeline_mode = #tpu.pipeline_mode<synchronous>, transform_indices = @transform_9, window_bounds = array<i64: 1, 256>}, {pipeline_mode = #tpu.pipeline_mode<synchronous>, transform_indices = @transform_10, window_bounds = array<i64: 256, 784>}, {pipeline_mode = #tpu.pipeline_mode<synchronous>, transform_indices = @transform_11, window_bounds = array<i64: 1, 784>}, {transform_indices = @transform_12, window_bounds = array<i64: 16, 24>}, {transform_indices = @transform_13, window_bounds = array<i64: 16, 784>}]} {
    %c0 = arith.constant 0 : index
    %c0_0 = arith.constant 0 : index
    %0 = vector.load %arg1[%c0, %c0_0] : memref<16x784xf32, #tpu.memory_space<vmem>>, vector<16x784xf32>
    %1 = arith.truncf %0 : vector<16x784xf32> to vector<16x784xbf16>
    %c0_1 = arith.constant 0 : index
    %c0_2 = arith.constant 0 : index
    %2 = vector.load %arg3[%c0_1, %c0_2] : memref<784x256xbf16, #tpu.memory_space<vmem>>, vector<784x256xbf16>
    %cst = arith.constant dense<0.000000e+00> : vector<16x256xf32>
    %3 = tpu.matmul %1, %2, %cst {dimension_numbers = #tpu.dot_dimension_numbers<[1], [0], [0], [1], [0, 0, 1, 1], [], []>} : vector<16x784xbf16>, vector<784x256xbf16>, vector<16x256xf32> -> vector<16x256xf32>
    %c0_3 = arith.constant 0 : index
    %c0_4 = arith.constant 0 : index
    %4 = vector.load %arg4[%c0_3, %c0_4] : memref<1x256xf32, #tpu.memory_space<vmem>>, vector<1x256xf32>
    %5 = vector.broadcast %4 : vector<1x256xf32> to vector<16x256xf32>
    %6 = arith.addf %3, %5 : vector<16x256xf32>
    %cst_5 = arith.constant 0.000000e+00 : f32
    %7 = vector.broadcast %cst_5 : f32 to vector<16x256xf32>
    %8 = arith.maximumf %6, %7 : vector<16x256xf32>
    %9 = arith.truncf %8 : vector<16x256xf32> to vector<16x256xbf16>
    %c0_6 = arith.constant 0 : index
    %c0_7 = arith.constant 0 : index
    %10 = vector.load %arg5[%c0_6, %c0_7] : memref<256x8xbf16, #tpu.memory_space<vmem>>, vector<256x8xbf16>
    %cst_8 = arith.constant dense<0.000000e+00> : vector<16x8xf32>
    %11 = tpu.matmul %9, %10, %cst_8 {dimension_numbers = #tpu.dot_dimension_numbers<[1], [0], [0], [1], [0, 0, 1, 1], [], []>} : vector<16x256xbf16>, vector<256x8xbf16>, vector<16x8xf32> -> vector<16x8xf32>
    %c0_9 = arith.constant 0 : index
    %c0_10 = arith.constant 0 : index
    %12 = vector.load %arg6[%c0_9, %c0_10] : memref<1x8xf32, #tpu.memory_space<vmem>>, vector<1x8xf32>
    %13 = vector.broadcast %12 : vector<1x8xf32> to vector<16x8xf32>
    %14 = arith.addf %11, %13 : vector<16x8xf32>
    %cst_11 = arith.constant 0.000000e+00 : f32
    %15 = vector.broadcast %cst_11 : f32 to vector<16x8xf32>
    %16 = arith.maximumf %14, %15 : vector<16x8xf32>
    %17 = arith.truncf %16 : vector<16x8xf32> to vector<16x8xbf16>
    %c0_12 = arith.constant 0 : index
    %c0_13 = arith.constant 0 : index
    %18 = vector.load %arg7[%c0_12, %c0_13] : memref<8x16xbf16, #tpu.memory_space<vmem>>, vector<8x16xbf16>
    %cst_14 = arith.constant dense<0.000000e+00> : vector<16x16xf32>
    %19 = tpu.matmul %17, %18, %cst_14 {dimension_numbers = #tpu.dot_dimension_numbers<[1], [0], [0], [1], [0, 0, 1, 1], [], []>} : vector<16x8xbf16>, vector<8x16xbf16>, vector<16x16xf32> -> vector<16x16xf32>
    %c0_15 = arith.constant 0 : index
    %c0_16 = arith.constant 0 : index
    %20 = vector.load %arg8[%c0_15, %c0_16] : memref<1x16xf32, #tpu.memory_space<vmem>>, vector<1x16xf32>
    %21 = vector.broadcast %20 : vector<1x16xf32> to vector<16x16xf32>
    %22 = arith.addf %19, %21 : vector<16x16xf32>
    %23 = vector.extract_strided_slice %22 {offsets = [0, 0], sizes = [16, 8], strides = [1, 1]} : vector<16x16xf32> to vector<16x8xf32>
    %24 = vector.extract_strided_slice %22 {offsets = [0, 8], sizes = [16, 8], strides = [1, 1]} : vector<16x16xf32> to vector<16x8xf32>
    %c0_17 = arith.constant 0 : index
    %c0_18 = arith.constant 0 : index
    %25 = vector.load %arg2[%c0_17, %c0_18] : memref<16x8xf32, #tpu.memory_space<vmem>>, vector<16x8xf32>
    %cst_19 = arith.constant 5.000000e-01 : f32
    %26 = vector.broadcast %cst_19 : f32 to vector<16x8xf32>
    %27 = arith.mulf %26, %24 : vector<16x8xf32>
    %28 = math.exp %27 : vector<16x8xf32>
    %29 = arith.mulf %25, %28 : vector<16x8xf32>
    %30 = arith.addf %23, %29 : vector<16x8xf32>
    %31 = arith.truncf %30 : vector<16x8xf32> to vector<16x8xbf16>
    %c0_20 = arith.constant 0 : index
    %c0_21 = arith.constant 0 : index
    %32 = vector.load %arg9[%c0_20, %c0_21] : memref<8x256xbf16, #tpu.memory_space<vmem>>, vector<8x256xbf16>
    %cst_22 = arith.constant dense<0.000000e+00> : vector<16x256xf32>
    %33 = tpu.matmul %31, %32, %cst_22 {dimension_numbers = #tpu.dot_dimension_numbers<[1], [0], [0], [1], [0, 0, 1, 1], [], []>} : vector<16x8xbf16>, vector<8x256xbf16>, vector<16x256xf32> -> vector<16x256xf32>
    %c0_23 = arith.constant 0 : index
    %c0_24 = arith.constant 0 : index
    %34 = vector.load %arg10[%c0_23, %c0_24] : memref<1x256xf32, #tpu.memory_space<vmem>>, vector<1x256xf32>
    %35 = vector.broadcast %34 : vector<1x256xf32> to vector<16x256xf32>
    %36 = arith.addf %33, %35 : vector<16x256xf32>
    %cst_25 = arith.constant 0.000000e+00 : f32
    %37 = vector.broadcast %cst_25 : f32 to vector<16x256xf32>
    %38 = arith.maximumf %36, %37 : vector<16x256xf32>
    %39 = arith.truncf %38 : vector<16x256xf32> to vector<16x256xbf16>
    %c0_26 = arith.constant 0 : index
    %c0_27 = arith.constant 0 : index
    %40 = vector.load %arg11[%c0_26, %c0_27] : memref<256x784xbf16, #tpu.memory_space<vmem>>, vector<256x784xbf16>
    %cst_28 = arith.constant dense<0.000000e+00> : vector<16x784xf32>
    %41 = tpu.matmul %39, %40, %cst_28 {dimension_numbers = #tpu.dot_dimension_numbers<[1], [0], [0], [1], [0, 0, 1, 1], [], []>} : vector<16x256xbf16>, vector<256x784xbf16>, vector<16x784xf32> -> vector<16x784xf32>
    %c0_29 = arith.constant 0 : index
    %c0_30 = arith.constant 0 : index
    %42 = vector.load %arg12[%c0_29, %c0_30] : memref<1x784xf32, #tpu.memory_space<vmem>>, vector<1x784xf32>
    %43 = vector.broadcast %42 : vector<1x784xf32> to vector<16x784xf32>
    %44 = arith.addf %41, %43 : vector<16x784xf32>
    %45 = arith.negf %44 : vector<16x784xf32>
    %46 = math.exp %45 : vector<16x784xf32>
    %cst_31 = arith.constant 1.000000e+00 : f32
    %47 = vector.broadcast %cst_31 : f32 to vector<16x784xf32>
    %48 = arith.addf %47, %46 : vector<16x784xf32>
    %49 = arith.divf %47, %48 : vector<16x784xf32>
    %50 = arith.truncf %49 : vector<16x784xf32> to vector<16x784xbf16>
    %c0_32 = arith.constant 0 : index
    %c0_33 = arith.constant 0 : index
    %51 = vector.load %arg14[%c0_32, %c0_33] : memref<16x784xbf16, #tpu.memory_space<vmem>>, vector<16x784xbf16>
    tpu.vector_store %arg14[%c0_32, %c0_33], %50 {strides = array<i32>} : memref<16x784xbf16, #tpu.memory_space<vmem>>, vector<16x784xbf16>,
    %52 = tpu.concatenate %16, %23, %24 in 1 : vector<16x8xf32>, vector<16x8xf32>, vector<16x8xf32> -> vector<16x24xf32>
    %c0_34 = arith.constant 0 : index
    %c0_35 = arith.constant 0 : index
    %53 = vector.load %arg13[%c0_34, %c0_35] : memref<16x24xf32, #tpu.memory_space<vmem>>, vector<16x24xf32>
    tpu.vector_store %arg13[%c0_34, %c0_35], %52 {strides = array<i32>} : memref<16x24xf32, #tpu.memory_space<vmem>>, vector<16x24xf32>,
    return
  }
  func.func @transform_0(%arg0: i32) -> (i32, i32) {
    %c0_i32 = arith.constant 0 : i32
    %c0_i32_0 = arith.constant 0 : i32
    return %arg0, %c0_i32 : i32, i32
  }
  func.func @transform_1(%arg0: i32) -> (i32, i32) {
    %c0_i32 = arith.constant 0 : i32
    %c0_i32_0 = arith.constant 0 : i32
    return %arg0, %c0_i32 : i32, i32
  }
  func.func @transform_2(%arg0: i32) -> (i32, i32) {
    %c0_i32 = arith.constant 0 : i32
    %c0_i32_0 = arith.constant 0 : i32
    %c0_i32_1 = arith.constant 0 : i32
    return %c0_i32, %c0_i32_0 : i32, i32
  }
  func.func @transform_3(%arg0: i32) -> (i32, i32) {
    %c0_i32 = arith.constant 0 : i32
    %c0_i32_0 = arith.constant 0 : i32
    %c0_i32_1 = arith.constant 0 : i32
    return %c0_i32, %c0_i32_0 : i32, i32
  }
  func.func @transform_4(%arg0: i32) -> (i32, i32) {
    %c0_i32 = arith.constant 0 : i32
    %c0_i32_0 = arith.constant 0 : i32
    %c0_i32_1 = arith.constant 0 : i32
    return %c0_i32, %c0_i32_0 : i32, i32
  }
  func.func @transform_5(%arg0: i32) -> (i32, i32) {
    %c0_i32 = arith.constant 0 : i32
    %c0_i32_0 = arith.constant 0 : i32
    %c0_i32_1 = arith.constant 0 : i32
    return %c0_i32, %c0_i32_0 : i32, i32
  }
  func.func @transform_6(%arg0: i32) -> (i32, i32) {
    %c0_i32 = arith.constant 0 : i32
    %c0_i32_0 = arith.constant 0 : i32
    %c0_i32_1 = arith.constant 0 : i32
    return %c0_i32, %c0_i32_0 : i32, i32
  }
  func.func @transform_7(%arg0: i32) -> (i32, i32) {
    %c0_i32 = arith.constant 0 : i32
    %c0_i32_0 = arith.constant 0 : i32
    %c0_i32_1 = arith.constant 0 : i32
    return %c0_i32, %c0_i32_0 : i32, i32
  }
  func.func @transform_8(%arg0: i32) -> (i32, i32) {
    %c0_i32 = arith.constant 0 : i32
    %c0_i32_0 = arith.constant 0 : i32
    %c0_i32_1 = arith.constant 0 : i32
    return %c0_i32, %c0_i32_0 : i32, i32
  }
  func.func @transform_9(%arg0: i32) -> (i32, i32) {
    %c0_i32 = arith.constant 0 : i32
    %c0_i32_0 = arith.constant 0 : i32
    %c0_i32_1 = arith.constant 0 : i32
    return %c0_i32, %c0_i32_0 : i32, i32
  }
  func.func @transform_10(%arg0: i32) -> (i32, i32) {
    %c0_i32 = arith.constant 0 : i32
    %c0_i32_0 = arith.constant 0 : i32
    %c0_i32_1 = arith.constant 0 : i32
    return %c0_i32, %c0_i32_0 : i32, i32
  }
  func.func @transform_11(%arg0: i32) -> (i32, i32) {
    %c0_i32 = arith.constant 0 : i32
    %c0_i32_0 = arith.constant 0 : i32
    %c0_i32_1 = arith.constant 0 : i32
    return %c0_i32, %c0_i32_0 : i32, i32
  }
  func.func @transform_12(%arg0: i32) -> (i32, i32) {
    %c0_i32 = arith.constant 0 : i32
    %c0_i32_0 = arith.constant 0 : i32
    return %arg0, %c0_i32 : i32, i32
  }
  func.func @transform_13(%arg0: i32) -> (i32, i32) {
    %c0_i32 = arith.constant 0 : i32
    %c0_i32_0 = arith.constant 0 : i32
    return %arg0, %c0_i32 : i32, i32
  }
}

</mosaic_0001>

<bundles_post_ra>
// kernel: vae_forward.1
= control target key start
LH: loop header
LB: loop body
LE: loop exit
PB: predicated region body
PF: predicated region fallthrough
CT: control target
= control target key end

     0   :  { %19 = vsyncpa [#allocation3], 0  ;;  %s6068_s0 = inlined_call_operand.vmem [shape: f32[32,784], index: 0, kind: input, shape index: {}]   ;;  %s6069_s1 = inlined_call_operand.vmem [shape: f32[32,8], index: 1, kind: input, shape index: {}]   ;;  %s6070_s2 = inlined_call_operand.vmem [shape: bf16[784,256], index: 2, kind: input, shape index: {}]   ;;  %s6071_s3 = inlined_call_operand.vmem [shape: f32[1,256], index: 3, kind: input, shape index: {}]   ;;  %s6072_s4 = inlined_call_operand.vmem [shape: bf16[256,8], index: 4, kind: input, shape index: {}]   ;;  %s6073_s5 = inlined_call_operand.vmem [shape: f32[1,8], index: 5, kind: input, shape index: {}]   ;;  %s6074_s6 = inlined_call_operand.vmem [shape: bf16[8,16], index: 6, kind: input, shape index: {}]   ;;  %s6075_s7 = inlined_call_operand.vmem [shape: f32[1,16], index: 7, kind: input, shape index: {}]   ;;  %s6076_s8 = inlined_call_operand.vmem [shape: bf16[8,256], index: 8, kind: input, shape index: {}]   ;;  %s6077_s9 = inlined_call_operand.vmem [shape: f32[1,256], index: 9, kind: input, shape index: {}]   ;;  %s6078_s10 = inlined_call_operand.vmem [shape: bf16[256,784], index: 10, kind: input, shape index: {}]   ;;  %s6079_s11 = inlined_call_operand.vmem [shape: f32[1,784], index: 11, kind: input, shape index: {}]   ;;  %s6080_s12 = inlined_call_operand.vmem [shape: f32[32,24], index: 12, kind: output, shape index: {0}]   ;;  %s6081_s13 = inlined_call_operand.hbm [shape: bf16[32,784], index: 13, kind: output, shape index: {1}]  }
   0x1   :  { %21 = vsyncpa [#allocation3 + $0x1], 0  ;;  %s4318_s25 = smov 0   ;;  %s4320_s26 = smov 0  }
   0x2   :  { %s4322_s27 = smov 0   ;;  %s4324_s28 = smov 0  }
   0x3 LB: > { %6087 = sst [smem:[#allocation5_spill]] %s4230_s25  ;;  %s4339_s29 = sadd.s32 4294967295, %s4242_s28   ;;  %s4242_s28 = sphi %s4324_s28, %s6114_s28   ;;  %s4238_s27 = sphi %s4322_s27, %s6116_s27   ;;  %s4234_s26 = sphi %s4320_s26, %s6118_s26   ;;  %s4230_s25 = sphi %s4318_s25, %s6117_s25  }
   0x4   : > { %6088 = sst [smem:[#allocation6_spill]] %s4238_s27  ;;  %s2908_s30 = sadd.s32 4294967294, %s4242_s28  }
   0x5   : > { %s4343_s14 = sadd.s32 1, %s4242_s28   ;;  %s322_s15 = sadd.s32 1, %s4238_s27 }
   0x6   : > { %6089 = sst [smem:[#allocation7_spill]] %s4343_s14  ;;  %s319_s16 = ssub.s32 %s4242_s28, %s4343_s14 }
   0x7   : > { %p332_p0 = scmp.ne.s32.totalorder %s4238_s27, %s4234_s26  ;;  %p320_p1 = scmp.eq.s32.totalorder %s319_s16, 0 }
   0x8   : > { %p333_p2 = scmp.eq.s32.totalorder %s4339_s29, 1  ;;  %p338_p3 = scmp.ne.s32.totalorder %s4234_s26, %s4230_s25 }
   0x9   : > { %p339_p4 = scmp.eq.s32.totalorder %s2908_s30, 1  ;;  %p2911_p7 = scmp.ge.s32.totalorder %s4242_s28, 1 }
   0xa   : > { %s4354_s17 = scalar_select %p320_p1, %s4238_s27, %s322_s15  }
   0xb   : > { %p4356_p5 = por %p333_p2, %p332_p0  ;;  %p4360_p6 = por %p339_p4, %p338_p3 }
   0xc   : > { %6090 = sst [smem:[#allocation8_spill]] %s4354_s17  ;;  %p406_p8 = scmp.lt.s32.totalorder %s4242_s28, 3 }
   0xd   : > { %s6092_s19 = scalar_select %p4360_p6, 1, 0 }
   0xe   : > { %p407_p9 = pnand %p2911_p7, %p406_p8 }
   0xf   : > { %6093 = sst [smem:[#allocation9_spill]] %s6092_s19  ;;  %s2912_s15 = sshll.u32 (!%p407_p9), %s4339_s29, 1 }
  0x10   : > { %410 = sbr.rel (%p407_p9) target bundleno = 1071 (0x42f), region = 68  ;;  %p462_p10 = scmp.lt.s32.totalorder (!%p407_p9), %s2912_s15, 3 }
  0x11   : > { %s4244_s17 = smov (!%p407_p9), 8   ;;  %s4245_s25 = smov (!%p407_p9), 120  }
  0x12   : > { %s4074_s16 = smul.u32 (!%p407_p9), 56, %s4339_s29 }
  0x14   : > { %s2805_s19 = scalar_lea.hbm (!%p407_p9), %s6081_s13, %s4074_s16 }
  0x15   : > { %v2976_v0 = vld [vmem:[%s6070_s2 + $0x70] sm:$0xf]  ;;  %v3861_v1 = vld [vmem:[%s6070_s2 + $0x74] sm:$0xf0]  ;;  %v2968_v11 = vld [vmem:[%s6070_s2 + $0x60] sm:$0xf] }
  0x16   : > { %v3104_v2 = vld [vmem:[%s6070_s2 + $0x170] sm:$0xf]  ;;  %v2977_v3 = vor.u32 %v3861_v1, %v2976_v0  ;;  %v3893_v4 = vld [vmem:[%s6070_s2 + $0x174] sm:$0xf0]  ;;  %v3859_v13 = vld [vmem:[%s6070_s2 + $0x64] sm:$0xf0] }
  0x17   : > { %v3168_v5 = vld [vmem:[%s6070_s2 + $0x1f0] sm:$0xf]  ;;  %v3909_v6 = vld [vmem:[%s6070_s2 + $0x1f4] sm:$0xf0]  ;;  %v3105_v7 = vor.u32 %v3893_v4, %v3104_v2  ;;  %v3096_v14 = vld [vmem:[%s6070_s2 + $0x160] sm:$0xf]  ;;  %v2969_v16 = vor.u32 %v3859_v13, %v2968_v11 }
  0x18   : > { %v3169_v8 = vor.u32 %v3909_v6, %v3168_v5  ;;  %v3040_v9 = vld [vmem:[%s6070_s2 + $0xf0] sm:$0xf]  ;;  %v3877_v10 = vld [vmem:[%s6070_s2 + $0xf4] sm:$0xf0]  ;;  %1101 = vmatpush.bf16.msra.mxu0 %v2977_v3  ;;  %v3891_v15 = vld [vmem:[%s6070_s2 + $0x164] sm:$0xf0] }
  0x19   : > { %v3041_v12 = vor.u32 %v3877_v10, %v3040_v9  ;;  %1129 = vmatpush.bf16.msra.mxu2 %v3105_v7  ;;  %v3097_v17 = vor.u32 %v3891_v15, %v3096_v14  ;;  %v3160_v18 = vld [vmem:[%s6070_s2 + $0x1e0] sm:$0xf]  ;;  %v3907_v19 = vld [vmem:[%s6070_s2 + $0x1e4] sm:$0xf0]  ;;  %v2960_v23 = vld [vmem:[%s6070_s2 + $0x50] sm:$0xf] }
  0x1a   : > { %1143 = vmatpush.bf16.msra.mxu3 %v3169_v8  ;;  %v3032_v20 = vld [vmem:[%s6070_s2 + $0xe0] sm:$0xf]  ;;  %v3161_v21 = vor.u32 %v3907_v19, %v3160_v18  ;;  %v3875_v22 = vld [vmem:[%s6070_s2 + $0xe4] sm:$0xf0]  ;;  %v3857_v24 = vld [vmem:[%s6070_s2 + $0x54] sm:$0xf0] }
  0x1b   : > { %1115 = vmatpush.bf16.msra.mxu1 %v3041_v12  ;;  %v3033_v25 = vor.u32 %v3875_v22, %v3032_v20  ;;  %v3088_v26 = vld [vmem:[%s6070_s2 + $0x150] sm:$0xf]  ;;  %v3889_v27 = vld [vmem:[%s6070_s2 + $0x154] sm:$0xf0]  ;;  %v2961_v29 = vor.u32 %v3857_v24, %v2960_v23  ;;  %v2952_v35 = vld [vmem:[%s6070_s2 + $0x40] sm:$0xf] }
  0x1c   : > { %v3152_v28 = vld [vmem:[%s6070_s2 + $0x1d0] sm:$0xf]  ;;  %1102 = vmatpush.bf16.msra.mxu0 %v2969_v16  ;;  %v3905_v30 = vld [vmem:[%s6070_s2 + $0x1d4] sm:$0xf0]  ;;  %v3089_v33 = vor.u32 %v3889_v27, %v3088_v26  ;;  %v3855_v36 = vld [vmem:[%s6070_s2 + $0x44] sm:$0xf0] }
  0x1d   : > { %v3024_v31 = vld [vmem:[%s6070_s2 + $0xd0] sm:$0xf]  ;;  %v3873_v32 = vld [vmem:[%s6070_s2 + $0xd4] sm:$0xf0]  ;;  %1130 = vmatpush.bf16.msra.mxu2 %v3097_v17  ;;  %v3153_v34 = vor.u32 %v3905_v30, %v3152_v28  ;;  %v3080_v37 = vld [vmem:[%s6070_s2 + $0x140] sm:$0xf]  ;;  %v2953_v44 = vor.u32 %v3855_v36, %v2952_v35 }
  0x1e   : > { %1144 = vmatpush.bf16.msra.mxu3 %v3161_v21  ;;  %v3025_v38 = vor.u32 %v3873_v32, %v3024_v31  ;;  %v3887_v39 = vld [vmem:[%s6070_s2 + $0x144] sm:$0xf0]  ;;  %v3144_v40 = vld [vmem:[%s6070_s2 + $0x1c0] sm:$0xf]  ;;  %v2944_v47 = vld [vmem:[%s6070_s2 + $0x30] sm:$0xf] }
  0x1f   : > { %1116 = vmatpush.bf16.msra.mxu1 %v3033_v25  ;;  %v3903_v41 = vld [vmem:[%s6070_s2 + $0x1c4] sm:$0xf0]  ;;  %v3016_v42 = vld [vmem:[%s6070_s2 + $0xc0] sm:$0xf]  ;;  %v3081_v45 = vor.u32 %v3887_v39, %v3080_v37  ;;  %v3853_v48 = vld [vmem:[%s6070_s2 + $0x34] sm:$0xf0] }
  0x20   : > { %v3871_v43 = vld [vmem:[%s6070_s2 + $0xc4] sm:$0xf0]  ;;  %1103 = vmatpush.bf16.msra.mxu0 %v2961_v29  ;;  %v3145_v46 = vor.u32 %v3903_v41, %v3144_v40  ;;  %v3072_v49 = vld [vmem:[%s6070_s2 + $0x130] sm:$0xf]  ;;  %v3885_v51 = vld [vmem:[%s6070_s2 + $0x134] sm:$0xf0]  ;;  %v2945_v56 = vor.u32 %v3853_v48, %v2944_v47 }
  0x21   : > { %1131 = vmatpush.bf16.msra.mxu2 %v3089_v33  ;;  %v3017_v50 = vor.u32 %v3871_v43, %v3016_v42  ;;  %v3136_v52 = vld [vmem:[%s6070_s2 + $0x1b0] sm:$0xf]  ;;  %v3901_v53 = vld [vmem:[%s6070_s2 + $0x1b4] sm:$0xf0]  ;;  %v3073_v57 = vor.u32 %v3885_v51, %v3072_v49  ;;  %v2936_v59 = vld [vmem:[%s6070_s2 + $0x20] sm:$0xf] }
  0x22   : > { %1145 = vmatpush.bf16.msra.mxu3 %v3153_v34  ;;  %v3008_v54 = vld [vmem:[%s6070_s2 + $0xb0] sm:$0xf]  ;;  %v3869_v55 = vld [vmem:[%s6070_s2 + $0xb4] sm:$0xf0]  ;;  %v3137_v58 = vor.u32 %v3901_v53, %v3136_v52  ;;  %v3851_v60 = vld [vmem:[%s6070_s2 + $0x24] sm:$0xf0] }
  0x23   : > { %1117 = vmatpush.bf16.msra.mxu1 %v3025_v38  ;;  %v3064_v61 = vld [vmem:[%s6070_s2 + $0x120] sm:$0xf]  ;;  %v3009_v62 = vor.u32 %v3869_v55, %v3008_v54  ;;  %v3883_v63 = vld [vmem:[%s6070_s2 + $0x124] sm:$0xf0]  ;;  %v2937_v4 = vor.u32 %v3851_v60, %v2936_v59  ;;  %v2928_v5 = vld [vmem:[%s6070_s2 + $0x10] sm:$0xf] }
  0x24   : > { %1104 = vmatpush.bf16.msra.mxu0 %v2953_v44  ;;  %v3128_v0 = vld [vmem:[%s6070_s2 + $0x1a0] sm:$0xf]  ;;  %v3899_v1 = vld [vmem:[%s6070_s2 + $0x1a4] sm:$0xf0]  ;;  %v3849_v6 = vld [vmem:[%s6070_s2 + $0x14] sm:$0xf0]  ;;  %v3065_v7 = vor.u32 %v3883_v63, %v3064_v61 }
  0x25   : > { %1132 = vmatpush.bf16.msra.mxu2 %v3081_v45  ;;  %v3000_v2 = vld [vmem:[%s6070_s2 + $0xa0] sm:$0xf]  ;;  %v3867_v3 = vld [vmem:[%s6070_s2 + $0xa4] sm:$0xf0]  ;;  %v3129_v8 = vor.u32 %v3899_v1, %v3128_v0  ;;  %v3056_v9 = vld [vmem:[%s6070_s2 + $0x110] sm:$0xf]  ;;  %v2929_v18 = vor.u32 %v3849_v6, %v2928_v5 }
  0x26   : > { %1146 = vmatpush.bf16.msra.mxu3 %v3145_v46  ;;  %v3881_v10 = vld [vmem:[%s6070_s2 + $0x114] sm:$0xf0]  ;;  %v3120_v11 = vld [vmem:[%s6070_s2 + $0x190] sm:$0xf]  ;;  %v3001_v12 = vor.u32 %v3867_v3, %v3000_v2  ;;  %v2920_v16 = vld [vmem:[%s6070_s2] sm:$0xf] }
  0x27   : > { %1118 = vmatpush.bf16.msra.mxu1 %v3017_v50  ;;  %v3897_v13 = vld [vmem:[%s6070_s2 + $0x194] sm:$0xf0]  ;;  %v2992_v14 = vld [vmem:[%s6070_s2 + $0x90] sm:$0xf]  ;;  %v3847_v17 = vld [vmem:[%s6070_s2 + $0x4] sm:$0xf0]  ;;  %v3057_v23 = vor.u32 %v3881_v10, %v3056_v9 }
  0x28   : > { %1105 = vmatpush.bf16.msra.mxu0 %v2945_v56  ;;  %v3865_v15 = vld [vmem:[%s6070_s2 + $0x94] sm:$0xf0]  ;;  %v3048_v19 = vld [vmem:[%s6070_s2 + $0x100] sm:$0xf]  ;;  %v3879_v20 = vld [vmem:[%s6070_s2 + $0x104] sm:$0xf0]  ;;  %v3121_v24 = vor.u32 %v3897_v13, %v3120_v11  ;;  %v2921_v34 = vor.u32 %v3847_v17, %v2920_v16 }
  0x29   : > { %1133 = vmatpush.bf16.msra.mxu2 %v3073_v57  ;;  %v3112_v21 = vld [vmem:[%s6070_s2 + $0x180] sm:$0xf]  ;;  %v3895_v22 = vld [vmem:[%s6070_s2 + $0x184] sm:$0xf0]  ;;  %v3232_v25 = vld [vmem:[%s6070_s2 + $0x270] sm:$0xf]  ;;  %v2993_v28 = vor.u32 %v3865_v15, %v2992_v14  ;;  %v3049_v37 = vor.u32 %v3879_v20, %v3048_v19 }
  0x2a   : > { %1147 = vmatpush.bf16.msra.mxu3 %v3137_v58  ;;  %v3925_v26 = vld [vmem:[%s6070_s2 + $0x274] sm:$0xf0]  ;;  %v3860_v27 = vld [vmem:[%s6070_s2 + $0x74] sm:$0xf]  ;;  %v2978_v29 = vld [vmem:[%s6070_s2 + $0x78] sm:$0xf0]  ;;  %v3113_v38 = vor.u32 %v3895_v22, %v3112_v21 }
  0x2b   : > { %1119 = vmatpush.bf16.msra.mxu1 %v3009_v62  ;;  %v2984_v30 = vld [vmem:[%s6070_s2 + $0x80] sm:$0xf]  ;;  %s6120_s15 = smov (!%p462_p10, %s2912_s15), 3  ;;  %v3863_v31 = vld [vmem:[%s6070_s2 + $0x84] sm:$0xf0]  ;;  %v3233_v42 = vor.u32 %v3925_v26, %v3232_v25  ;;  %v2981_v43 = vor.u32 %v3860_v27, %v2978_v29  ;;  %vm1097_vm0 = vcmask 130048  }
  0x2c   : > { %1106 = vmatpush.bf16.msra.mxu0 %v2937_v4  ;;  %v3296_v32 = vld [vmem:[%s6070_s2 + $0x2f0] sm:$0xf]  ;;  %v3941_v33 = vld [vmem:[%s6070_s2 + $0x2f4] sm:$0xf0]  ;;  %s4073_s20 = smul.u32 56, %s6120_s15  ;;  %v2985_v47 = vor.u32 %v3863_v31, %v2984_v30  ;;  %vm1475_vm1 = vcmask 1043456  }
  0x2d   : > { %1134 = vmatpush.bf16.msra.mxu2 %v3065_v7  ;;  %v3304_v35 = vld [vmem:[%s6070_s2 + $0x300] sm:$0xf]  ;;  %v3943_v36 = vld [vmem:[%s6070_s2 + $0x304] sm:$0xf0]  ;;  %v3876_v39 = vld [vmem:[%s6070_s2 + $0xf4] sm:$0xf]  ;;  %v3297_v54 = vor.u32 %v3941_v33, %v3296_v32 }
  0x2e   : > { %1148 = vmatpush.bf16.msra.mxu3 %v3129_v8  ;;  %v3042_v40 = vld [vmem:[%s6070_s2 + $0xf8] sm:$0xf0]  ;;  %v3224_v41 = vld [vmem:[%s6070_s2 + $0x260] sm:$0xf]  ;;  %s4598_s22 = scalar_lea.vmem %s6068_s0, %s4073_s20  ;;  %v3923_v44 = vld [vmem:[%s6070_s2 + $0x264] sm:$0xf0]  ;;  %v3305_v50 = vor.u32 %v3943_v36, %v3304_v35 }
  0x2f   : > { %1120 = vmatpush.bf16.msra.mxu1 %v3001_v12  ;;  %v3858_v45 = vld [vmem:[%s6070_s2 + $0x64] sm:$0xf]  ;;  %v2970_v46 = vld [vmem:[%s6070_s2 + $0x68] sm:$0xf0]  ;;  %v484_v48 = vld [vmem:[%s4598_s22 + $0x10] sm:$0xff]  ;;  %v3045_v58 = vor.u32 %v3876_v39, %v3042_v40  ;;  %v3225_v0 = vor.u32 %v3923_v44, %v3224_v41  ;;  %vm1471_vm2 = vcmask 64512  }
  0x30   : > { %1107 = vmatpush.bf16.msra.mxu0 %v2929_v18  ;;  %v491_v49 = vld [vmem:[%s4598_s22 + $0x48] sm:$0xff]  ;;  %v482_v51 = vld [vmem:[%s4598_s22] sm:$0xff]  ;;  %v489_v55 = vld [vmem:[%s4598_s22 + $0x38] sm:$0xff]  ;;  %v2973_v3 = vor.u32 %v3858_v45, %v2970_v46  ;;  %s6094_s23 = sshll.u32 %s6120_s15, 3  ;;  %vm2780_vm3 = vcmask 195584   ;;  %s2808_s21 = sshll.u32 %s2805_s19, 4  ;;  %s2809_s21 = int_to_ptr.hbm [resolvable:$true] %s2808_s21 }
  0x31   : > { %1135 = vmatpush.bf16.msra.mxu2 %v3057_v23  ;;  %v3288_v52 = vld [vmem:[%s6070_s2 + $0x2e0] sm:$0xf]  ;;  %v4615_v53 = vpack.c.bf16 %v491_v49, %v484_v48  ;;  %v485_v56 = vld [vmem:[%s4598_s22 + $0x18] sm:$0xff]  ;;  %v492_v57 = vld [vmem:[%s4598_s22 + $0x50] sm:$0xff]  ;;  %v4620_v59 = vpack.c.bf16 %v489_v55, %v482_v51  ;;  %s5152_s30 = scalar_lea.vmem %s6080_s12, %s6094_s23  ;;  %s6095_s23 = sshll.u32 %s6120_s15, 3 }
  0x32   : > { %1149 = vmatpush.bf16.msra.mxu3 %v3121_v24  ;;  %v483_v60 = vld [vmem:[%s4598_s22 + $0x8] sm:$0xff]  ;;  %v490_v61 = vld [vmem:[%s4598_s22 + $0x40] sm:$0xff]  ;;  %v4627_v63 = vpack.c.bf16 %v492_v57, %v485_v56  ;;  %v3216_v5 = vld [vmem:[%s6070_s2 + $0x250] sm:$0xf]  ;;  %s472_s27 = scalar_lea.vmem %s6069_s1, %s6095_s23 }
  0x33   : > { %1121 = vmatpush.bf16.msra.mxu1 %v2993_v28  ;;  %v3939_v62 = vld [vmem:[%s6070_s2 + $0x2e4] sm:$0xf0]  ;;  %v3874_v1 = vld [vmem:[%s6070_s2 + $0xe4] sm:$0xf]  ;;  %v3034_v2 = vld [vmem:[%s6070_s2 + $0xe8] sm:$0xf0]  ;;  %v4635_v4 = vpack.c.bf16 %v490_v61, %v483_v60 }
  0x34   : > { %1108 = vmatpush.bf16.msra.mxu0 %v2921_v34  ;;  %v3921_v6 = vld [vmem:[%s6070_s2 + $0x254] sm:$0xf0]  ;;  %v3289_v7 = vor.u32 %v3939_v62, %v3288_v52  ;;  %v3856_v8 = vld [vmem:[%s6070_s2 + $0x54] sm:$0xf]  ;;  %v2962_v9 = vld [vmem:[%s6070_s2 + $0x58] sm:$0xf0]  ;;  %v3037_v10 = vor.u32 %v3874_v1, %v3034_v2 }
  0x35   : > { %1136 = vmatpush.bf16.msra.mxu2 %v3049_v37  ;;  %v3280_v11 = vld [vmem:[%s6070_s2 + $0x2d0] sm:$0xf]  ;;  %v3937_v12 = vld [vmem:[%s6070_s2 + $0x2d4] sm:$0xf0]  ;;  %v3217_v13 = vor.u32 %v3921_v6, %v3216_v5  ;;  %v3872_v14 = vld [vmem:[%s6070_s2 + $0xd4] sm:$0xf]  ;;  %v2965_v16 = vor.u32 %v3856_v8, %v2962_v9 }
  0x36   : > { %1150 = vmatpush.bf16.msra.mxu3 %v3113_v38  ;;  %v3026_v15 = vld [vmem:[%s6070_s2 + $0xd8] sm:$0xf0]  ;;  %v3208_v17 = vld [vmem:[%s6070_s2 + $0x240] sm:$0xf]  ;;  %v3919_v18 = vld [vmem:[%s6070_s2 + $0x244] sm:$0xf0]  ;;  %v3281_v19 = vor.u32 %v3937_v12, %v3280_v11 }
  0x37   : > { %1122 = vmatpush.bf16.msra.mxu1 %v2985_v47  ;;  %1109 = vmatmul.bf16.vlgmr.msra.gmra.mxu0 %v4620_v59  ;;  %v3854_v20 = vld [vmem:[%s6070_s2 + $0x44] sm:$0xf]  ;;  %v2954_v21 = vld [vmem:[%s6070_s2 + $0x48] sm:$0xf0]  ;;  %v3029_v22 = vor.u32 %v3872_v14, %v3026_v15  ;;  %v3272_v23 = vld [vmem:[%s6070_s2 + $0x2c0] sm:$0xf]  ;;  %v3209_v25 = vor.u32 %v3919_v18, %v3208_v17 }
  0x38   : > { %1157 = vmatpush.bf16.msrb.mxu0 %v3233_v42  ;;  %1137 = vmatmul.bf16.vlgmr.msra.gmra.mxu2 %v4615_v53  ;;  %v3935_v24 = vld [vmem:[%s6070_s2 + $0x2c4] sm:$0xf0]  ;;  %v3870_v26 = vld [vmem:[%s6070_s2 + $0xc4] sm:$0xf]  ;;  %v3018_v27 = vld [vmem:[%s6070_s2 + $0xc8] sm:$0xf0]  ;;  %v2957_v28 = vor.u32 %v3854_v20, %v2954_v21 }
  0x39   : > { %1192 = vmatpush.bf16.msrb.mxu2 %v3305_v50  ;;  %1151 = vmatmul.bf16.vlgmr.msra.gmra.mxu3 %v4627_v63  ;;  %v3200_v29 = vld [vmem:[%s6070_s2 + $0x230] sm:$0xf]  ;;  %v3917_v30 = vld [vmem:[%s6070_s2 + $0x234] sm:$0xf0]  ;;  %v3273_v31 = vor.u32 %v3935_v24, %v3272_v23  ;;  %v3852_v32 = vld [vmem:[%s6070_s2 + $0x34] sm:$0xf]  ;;  %v3021_v34 = vor.u32 %v3870_v26, %v3018_v27 }
  0x3a   : > { %1199 = vmatpush.bf16.msrb.mxu3 %v2981_v43  ;;  %1123 = vmatmul.bf16.vlgmr.msra.gmra.mxu1 %v4635_v4  ;;  %v2946_v33 = vld [vmem:[%s6070_s2 + $0x38] sm:$0xf0]  ;;  %v3264_v35 = vld [vmem:[%s6070_s2 + $0x2b0] sm:$0xf]  ;;  %v3933_v36 = vld [vmem:[%s6070_s2 + $0x2b4] sm:$0xf0]  ;;  %v3201_v38 = vor.u32 %v3917_v30, %v3200_v29 }
  0x3b   : > { %1171 = vmatpush.bf16.msrb.mxu1 %v3297_v54  ;;  %v3868_v37 = vld [vmem:[%s6070_s2 + $0xb4] sm:$0xf]  ;;  %v3010_v39 = vld [vmem:[%s6070_s2 + $0xb8] sm:$0xf0]  ;;  %v495_v41 = vld [vmem:[%s4598_s22 + $0x68] sm:$0xff]  ;;  %v2949_v42 = vor.u32 %v3852_v32, %v2946_v33  ;;  %v3265_v45 = vor.u32 %v3933_v36, %v3264_v35 }
  0x3c   : > { %1158 = vmatpush.bf16.msrb.mxu0 %v3225_v0  ;;  %v488_v40 = vld [vmem:[%s4598_s22 + $0x30] sm:$0xff]  ;;  %v3192_v43 = vld [vmem:[%s6070_s2 + $0x220] sm:$0xf]  ;;  %v3915_v44 = vld [vmem:[%s6070_s2 + $0x224] sm:$0xf0]  ;;  %v3013_v49 = vor.u32 %v3868_v37, %v3010_v39 }
  0x3d   : > { %1213 = vmatpush.bf16.msra.mxu2 %v3045_v58  ;;  %v3850_v46 = vld [vmem:[%s6070_s2 + $0x24] sm:$0xf]  ;;  %v2938_v47 = vld [vmem:[%s6070_s2 + $0x28] sm:$0xf0]  ;;  %v4727_v48 = vpack.c.bf16 %v495_v41, %v488_v40  ;;  %v3256_v50 = vld [vmem:[%s6070_s2 + $0x2a0] sm:$0xf]  ;;  %v3193_v52 = vor.u32 %v3915_v44, %v3192_v43 }
  0x3e   : > { %1200 = vmatpush.bf16.msrb.mxu3 %v2973_v3  ;;  %v3931_v51 = vld [vmem:[%s6070_s2 + $0x2a4] sm:$0xf0]  ;;  %v3866_v54 = vld [vmem:[%s6070_s2 + $0xa4] sm:$0xf]  ;;  %v3002_v55 = vld [vmem:[%s6070_s2 + $0xa8] sm:$0xf0]  ;;  %v2941_v56 = vor.u32 %v3850_v46, %v2938_v47 }
  0x3f   : > { %1172 = vmatpush.bf16.msrb.mxu1 %v3289_v7  ;;  %v3184_v57 = vld [vmem:[%s6070_s2 + $0x210] sm:$0xf]  ;;  %v3913_v58 = vld [vmem:[%s6070_s2 + $0x214] sm:$0xf0]  ;;  %v3848_v60 = vld [vmem:[%s6070_s2 + $0x14] sm:$0xf]  ;;  %v3257_v61 = vor.u32 %v3931_v51, %v3256_v50  ;;  %v3005_v2 = vor.u32 %v3866_v54, %v3002_v55 }
  0x40   : > { %1159 = vmatpush.bf16.msrb.mxu0 %v3217_v13  ;;  %v2930_v62 = vld [vmem:[%s6070_s2 + $0x18] sm:$0xf0]  ;;  %v3248_v0 = vld [vmem:[%s6070_s2 + $0x290] sm:$0xf]  ;;  %v3929_v1 = vld [vmem:[%s6070_s2 + $0x294] sm:$0xf0]  ;;  %v3185_v7 = vor.u32 %v3913_v58, %v3184_v57 }
  0x41   : > { %1214 = vmatpush.bf16.msra.mxu2 %v3037_v10  ;;  %v3864_v3 = vld [vmem:[%s6070_s2 + $0x94] sm:$0xf]  ;;  %v2994_v5 = vld [vmem:[%s6070_s2 + $0x98] sm:$0xf0]  ;;  %v3176_v6 = vld [vmem:[%s6070_s2 + $0x200] sm:$0xf]  ;;  %v2933_v11 = vor.u32 %v3848_v60, %v2930_v62  ;;  %v3249_v15 = vor.u32 %v3929_v1, %v3248_v0 }
  0x42   : > { %1201 = vmatpush.bf16.msrb.mxu3 %v2965_v16  ;;  %v3911_v8 = vld [vmem:[%s6070_s2 + $0x204] sm:$0xf0]  ;;  %v3846_v9 = vld [vmem:[%s6070_s2 + $0x4] sm:$0xf]  ;;  %v2922_v10 = vld [vmem:[%s6070_s2 + $0x8] sm:$0xf0] }
  0x43   : > { %1173 = vmatpush.bf16.msrb.mxu1 %v3281_v19  ;;  %v3892_v12 = vld [vmem:[%s6070_s2 + $0x174] sm:$0xf]  ;;  %v3106_v13 = vld [vmem:[%s6070_s2 + $0x178] sm:$0xf0]  ;;  %v3240_v17 = vld [vmem:[%s6070_s2 + $0x280] sm:$0xf]  ;;  %v2997_v19 = vor.u32 %v3864_v3, %v2994_v5  ;;  %v3177_v23 = vor.u32 %v3911_v8, %v3176_v6  ;;  %v2925_v27 = vor.u32 %v3846_v9, %v2922_v10 }
  0x44   : > { %1160 = vmatpush.bf16.msrb.mxu0 %v3209_v25  ;;  %v3924_v14 = vld [vmem:[%s6070_s2 + $0x274] sm:$0xf]  ;;  %v3234_v16 = vld [vmem:[%s6070_s2 + $0x278] sm:$0xf0]  ;;  %v3927_v18 = vld [vmem:[%s6070_s2 + $0x284] sm:$0xf0] }
  0x45   : > { %1215 = vmatpush.bf16.msra.mxu2 %v3029_v22  ;;  %v486_v20 = vld [vmem:[%s4598_s22 + $0x20] sm:$0xff]  ;;  %v493_v21 = vld [vmem:[%s4598_s22 + $0x58] sm:$0xff]  ;;  %v2986_v24 = vld [vmem:[%s6070_s2 + $0x88] sm:$0xf0]  ;;  %v3237_v32 = vor.u32 %v3924_v14, %v3234_v16  ;;  %v3241_v33 = vor.u32 %v3927_v18, %v3240_v17 }
  0x46   : > { %1202 = vmatpush.bf16.msrb.mxu3 %v2957_v28  ;;  %v3862_v22 = vld [vmem:[%s6070_s2 + $0x84] sm:$0xf]  ;;  %v3908_v25 = vld [vmem:[%s6070_s2 + $0x1f4] sm:$0xf]  ;;  %v3170_v26 = vld [vmem:[%s6070_s2 + $0x1f8] sm:$0xf0]  ;;  %v3109_v28 = vor.u32 %v3892_v12, %v3106_v13  ;;  %v4825_v37 = vpack.c.bf16 %v493_v21, %v486_v20 }
  0x47   : > { %1174 = vmatpush.bf16.msrb.mxu1 %v3273_v31  ;;  %v3940_v29 = vld [vmem:[%s6070_s2 + $0x2f4] sm:$0xf]  ;;  %v3298_v30 = vld [vmem:[%s6070_s2 + $0x2f8] sm:$0xf0]  ;;  %v487_v31 = vld [vmem:[%s4598_s22 + $0x28] sm:$0xff]  ;;  %v3173_v41 = vor.u32 %v3908_v25, %v3170_v26 }
  0x48   : > { %1161 = vmatpush.bf16.msrb.mxu0 %v3201_v38  ;;  %3310 = vmatmul.msk.bf16.vlgmr.msrb.gmra.mxu2 %vm1097_vm0, %v4727_v48  ;;  %v3890_v35 = vld [vmem:[%s6070_s2 + $0x164] sm:$0xf]  ;;  %v3098_v36 = vld [vmem:[%s6070_s2 + $0x168] sm:$0xf0]  ;;  %v2989_v38 = vor.u32 %v3862_v22, %v2986_v24  ;;  %v3888_v51 = vld [vmem:[%s6070_s2 + $0x154] sm:$0xf] }
  0x49   : > { %1216 = vmatpush.bf16.msra.mxu2 %v3021_v34  ;;  %v494_v34 = vld [vmem:[%s4598_s22 + $0x60] sm:$0xff]  ;;  %v3226_v40 = vld [vmem:[%s6070_s2 + $0x268] sm:$0xf0]  ;;  %v3920_v54 = vld [vmem:[%s6070_s2 + $0x254] sm:$0xf]  ;;  %s4194_s22 = sshra.s32 %s2809_s21, 4  ;;  %s4195_s22 = int_to_ptr.hbm [resolvable:$true] %s4194_s22 }
  0x4a   : > { %1203 = vmatpush.bf16.msrb.mxu3 %v2949_v42  ;;  %v3922_v39 = vld [vmem:[%s6070_s2 + $0x264] sm:$0xf]  ;;  %v3301_v42 = vor.u32 %v3940_v29, %v3298_v30  ;;  %v4836_v44 = vpack.c.bf16 %v494_v34, %v487_v31  ;;  %v3162_v46 = vld [vmem:[%s6070_s2 + $0x1e8] sm:$0xf0]  ;;  %v3218_v55 = vld [vmem:[%s6070_s2 + $0x258] sm:$0xf0]  ;;  %p4201_p0 = scmp.lt.s32.totalorder %s4195_s22, %s6081_s13 }
  0x4b   : > { %1175 = vmatpush.bf16.msrb.mxu1 %v3265_v45  ;;  %v3906_v43 = vld [vmem:[%s6070_s2 + $0x1e4] sm:$0xf]  ;;  %v3101_v45 = vor.u32 %v3890_v35, %v3098_v36  ;;  %v3229_v50 = vor.u32 %v3922_v39, %v3226_v40  ;;  %v3904_v58 = vld [vmem:[%s6070_s2 + $0x1d4] sm:$0xf]  ;;  %v3282_v0 = vld [vmem:[%s6070_s2 + $0x2d8] sm:$0xf0]  ;;  %v3221_v1 = vor.u32 %v3920_v54, %v3218_v55 }
  0x4c   : > { %1162 = vmatpush.bf16.msrb.mxu0 %v3193_v52  ;;  %v3938_v47 = vld [vmem:[%s6070_s2 + $0x2e4] sm:$0xf]  ;;  %v3090_v52 = vld [vmem:[%s6070_s2 + $0x158] sm:$0xf0]  ;;  %v3936_v62 = vld [vmem:[%s6070_s2 + $0x2d4] sm:$0xf] }
  0x4d   : > { %1217 = vmatpush.bf16.msra.mxu2 %v3013_v49  ;;  %v3290_v49 = vld [vmem:[%s6070_s2 + $0x2e8] sm:$0xf0]  ;;  %v3093_v60 = vor.u32 %v3888_v51, %v3090_v52  ;;  %v3918_v5 = vld [vmem:[%s6070_s2 + $0x244] sm:$0xf]  ;;  %v3285_v8 = vor.u32 %v3936_v62, %v3282_v0  ;;  %v3884_v12 = vld [vmem:[%s6070_s2 + $0x134] sm:$0xf] }
  0x4e   : > { %1204 = vmatpush.bf16.msrb.mxu3 %v2941_v56  ;;  %v3165_v56 = vor.u32 %v3906_v43, %v3162_v46  ;;  %v3293_v57 = vor.u32 %v3938_v47, %v3290_v49  ;;  %v3082_v3 = vld [vmem:[%s6070_s2 + $0x148] sm:$0xf0]  ;;  %v3902_v9 = vld [vmem:[%s6070_s2 + $0x1c4] sm:$0xf]  ;;  %v3074_v14 = vld [vmem:[%s6070_s2 + $0x138] sm:$0xf0] }
  0x4f   : > { %1176 = vmatpush.bf16.msrb.mxu1 %v3257_v61  ;;  %v3154_v61 = vld [vmem:[%s6070_s2 + $0x1d8] sm:$0xf0]  ;;  %v3210_v6 = vld [vmem:[%s6070_s2 + $0x248] sm:$0xf0]  ;;  %v3077_v20 = vor.u32 %v3884_v12, %v3074_v14  ;;  %v3932_v22 = vld [vmem:[%s6070_s2 + $0x2b4] sm:$0xf] }
  0x50   : > { %1163 = vmatpush.bf16.msrb.mxu0 %v3185_v7  ;;  %v3157_v7 = vor.u32 %v3904_v58, %v3154_v61  ;;  %v3213_v13 = vor.u32 %v3918_v5, %v3210_v6  ;;  %v3202_v16 = vld [vmem:[%s6070_s2 + $0x238] sm:$0xf0]  ;;  %v3882_v25 = vld [vmem:[%s6070_s2 + $0x124] sm:$0xf]  ;;  %v3066_v26 = vld [vmem:[%s6070_s2 + $0x128] sm:$0xf0] }
  0x51   : > { %1218 = vmatpush.bf16.msra.mxu2 %v3005_v2  ;;  %v3886_v2 = vld [vmem:[%s6070_s2 + $0x144] sm:$0xf]  ;;  %v3138_v21 = vld [vmem:[%s6070_s2 + $0x1b8] sm:$0xf0]  ;;  %v3258_v35 = vld [vmem:[%s6070_s2 + $0x2a8] sm:$0xf0] }
  0x52   : > { %1205 = vmatpush.bf16.msrb.mxu3 %v2933_v11  ;;  %v3085_v10 = vor.u32 %v3886_v2, %v3082_v3  ;;  %v3934_v11 = vld [vmem:[%s6070_s2 + $0x2c4] sm:$0xf]  ;;  %v3058_v39 = vld [vmem:[%s6070_s2 + $0x118] sm:$0xf0]  ;;  %v3912_v40 = vld [vmem:[%s6070_s2 + $0x214] sm:$0xf] }
  0x53   : > { %1177 = vmatpush.bf16.msrb.mxu1 %v3249_v15  ;;  %v3916_v15 = vld [vmem:[%s6070_s2 + $0x234] sm:$0xf]  ;;  %v3898_v31 = vld [vmem:[%s6070_s2 + $0x1a4] sm:$0xf]  ;;  %v3122_v47 = vld [vmem:[%s6070_s2 + $0x198] sm:$0xf0] }
  0x54   : > { %1164 = vmatpush.bf16.msrb.mxu0 %v3177_v23  ;;  %v3266_v23 = vld [vmem:[%s6070_s2 + $0x2b8] sm:$0xf0]  ;;  %v3205_v24 = vor.u32 %v3916_v15, %v3202_v16  ;;  %v3930_v34 = vld [vmem:[%s6070_s2 + $0x2a4] sm:$0xf]  ;;  %v3928_v49 = vld [vmem:[%s6070_s2 + $0x294] sm:$0xf] }
  0x55   : > { %1219 = vmatpush.bf16.msra.mxu2 %v2997_v19  ;;  %v3900_v19 = vld [vmem:[%s6070_s2 + $0x1b4] sm:$0xf]  ;;  %v3269_v30 = vor.u32 %v3932_v22, %v3266_v23  ;;  %v3261_v43 = vor.u32 %v3930_v34, %v3258_v35  ;;  %v3878_v52 = vld [vmem:[%s6070_s2 + $0x104] sm:$0xf]  ;;  %v3050_v54 = vld [vmem:[%s6070_s2 + $0x108] sm:$0xf0] }
  0x56   : > { %1206 = vmatpush.bf16.msrb.mxu3 %v2925_v27  ;;  %v3914_v27 = vld [vmem:[%s6070_s2 + $0x224] sm:$0xf]  ;;  %v3141_v29 = vor.u32 %v3900_v19, %v3138_v21  ;;  %v3306_v58 = vld [vmem:[%s6070_s2 + $0x308] sm:$0xf0]  ;;  %v3053_v62 = vor.u32 %v3878_v52, %v3050_v54  ;;  %v3959_v22 = vld [vmem:[%s6072_s4 + $0x78] sm:$0xff] }
  0x57   : > { %1178 = vmatpush.bf16.msrb.mxu1 %v3241_v33  ;;  %1165 = vmatmul.bf16.vlgmr.msrb.gmra.mxu0 %v4825_v37  ;;  %v3130_v33 = vld [vmem:[%s6070_s2 + $0x1a8] sm:$0xf0]  ;;  %v3910_v55 = vld [vmem:[%s6070_s2 + $0x204] sm:$0xf] }
  0x58   : > { %1227 = vmatpush.bf16.msra.mxu0 %v3109_v28  ;;  %v3194_v28 = vld [vmem:[%s6070_s2 + $0x228] sm:$0xf0]  ;;  %v3894_v0 = vld [vmem:[%s6070_s2 + $0x184] sm:$0xf] }
  0x59   : > { %1220 = vmatpush.bf16.msra.mxu2 %v2989_v38  ;;  %1207 = vmatmul.bf16.vlgmr.msrb.gmra.mxu3 %v4620_v59  ;;  %v3274_v59 = vld [vmem:[%s6070_s2 + $0x2c8] sm:$0xf0]  ;;  %v3197_v36 = vor.u32 %v3914_v27, %v3194_v28  ;;  %v3880_v38 = vld [vmem:[%s6070_s2 + $0x114] sm:$0xf]  ;;  %v3926_v3 = vld [vmem:[%s6070_s2 + $0x284] sm:$0xf] }
  0x5a   : > { %1255 = vmatpush.bf16.msra.mxu3 %v3237_v32  ;;  %1179 = vmatmul.bf16.vlgmr.msrb.gmra.mxu1 %v4836_v44  ;;  %v3277_v18 = vor.u32 %v3934_v11, %v3274_v59  ;;  %v3069_v32 = vor.u32 %v3882_v25, %v3066_v26  ;;  %v3061_v46 = vor.u32 %v3880_v38, %v3058_v39  ;;  %v3242_v5 = vld [vmem:[%s6070_s2 + $0x288] sm:$0xf0]  ;;  %v3944_v12 = vld [vmem:[%s6072_s4] sm:$0xff]  ;;  %v3958_v27 = vld [vmem:[%s6072_s4 + $0x70] sm:$0xff] }
  0x5b   : > { %1241 = vmatpush.bf16.msra.mxu1 %v3173_v41  ;;  %v3186_v41 = vld [vmem:[%s6070_s2 + $0x218] sm:$0xf0]  ;;  %v3956_v38 = vld [vmem:[%s6072_s4 + $0x60] sm:$0xff]  ;;  %v3953_v54 = vld [vmem:[%s6072_s4 + $0x48] sm:$0xff] }
  0x5c   : > { %1228 = vmatpush.bf16.msra.mxu0 %v3101_v45  ;;  %1221 = vmatmul.bf16.vlgmr.msra.gmra.mxu2 %v4635_v4  ;;  %v3146_v4 = vld [vmem:[%s6070_s2 + $0x1c8] sm:$0xf0]  ;;  %v3896_v45 = vld [vmem:[%s6070_s2 + $0x194] sm:$0xf]  ;;  %v3189_v51 = vor.u32 %v3912_v40, %v3186_v41 }
  0x5d   : > { %1269 = vmatpush.bf16.msrb.mxu2 %v3301_v42  ;;  %v3149_v17 = vor.u32 %v3902_v9, %v3146_v4  ;;  %v3133_v42 = vor.u32 %v3898_v31, %v3130_v33  ;;  %v3951_v9 = vld [vmem:[%s6072_s4 + $0x38] sm:$0xff]  ;;  %v3950_v4 = vld [vmem:[%s6072_s4 + $0x30] sm:$0xff]  ;;  %v3957_v33 = vld [vmem:[%s6072_s4 + $0x68] sm:$0xff] }
  0x5e   : > { %1256 = vmatpush.bf16.msra.mxu3 %v3229_v50  ;;  %v3250_v50 = vld [vmem:[%s6070_s2 + $0x298] sm:$0xf0] }
  0x5f   : > { %1242 = vmatpush.bf16.msra.mxu1 %v3165_v56  ;;  %v3178_v56 = vld [vmem:[%s6070_s2 + $0x208] sm:$0xf0]  ;;  %v3253_v61 = vor.u32 %v3928_v49, %v3250_v50  ;;  %v3954_v50 = vld [vmem:[%s6072_s4 + $0x50] sm:$0xff] }
  0x60   : > { %1229 = vmatpush.bf16.msra.mxu0 %v3093_v60  ;;  %v3125_v60 = vor.u32 %v3896_v45, %v3122_v47  ;;  %v3181_v2 = vor.u32 %v3910_v55, %v3178_v56  ;;  %v3955_v45 = vld [vmem:[%s6072_s4 + $0x58] sm:$0xff]  ;;  %v3952_v56 = vld [vmem:[%s6072_s4 + $0x40] sm:$0xff] }
  0x61   : > { %1270 = vmatpush.bf16.msrb.mxu2 %v3293_v57  ;;  %v3942_v57 = vld [vmem:[%s6070_s2 + $0x304] sm:$0xf] }
  0x62   : > { %1257 = vmatpush.bf16.msra.mxu3 %v3221_v1  ;;  %v3114_v1 = vld [vmem:[%s6070_s2 + $0x188] sm:$0xf0]  ;;  %v3309_v6 = vor.u32 %v3942_v57, %v3306_v58 }
  0x63   : > { %1243 = vmatpush.bf16.msra.mxu1 %v3157_v7  ;;  %v3117_v7 = vor.u32 %v3894_v0, %v3114_v1 }
  0x64   : > { %1230 = vmatpush.bf16.msra.mxu0 %v3085_v10  ;;  %v601_v10 = vld [vmem:[%s6071_s3] sm:$0x3] }
  0x65   : > { %1271 = vmatpush.bf16.msrb.mxu2 %v3285_v8  ;;  %v3245_v8 = vor.u32 %v3926_v3, %v3242_v5  ;;  %v603_v14 = vperm.slane %v601_v10, 0  ;;  %v604_v57 = vperm.slane %v601_v10, 1 }
  0x66   : > { %1258 = vmatpush.bf16.msra.mxu3 %v3213_v13 }
  0x67   : > { %1244 = vmatpush.bf16.msra.mxu1 %v3149_v17 }
  0x68   : > { %1231 = vmatpush.bf16.msra.mxu0 %v3077_v20 }
  0x69   : > { %1272 = vmatpush.bf16.msrb.mxu2 %v3277_v18 }
  0x6a   : > { %1259 = vmatpush.bf16.msra.mxu3 %v3205_v24 }
  0x6b   : > { %1245 = vmatpush.bf16.msra.mxu1 %v3141_v29 }
  0x6c   : > { %1232 = vmatpush.bf16.msra.mxu0 %v3069_v32 }
  0x6d   : > { %1273 = vmatpush.bf16.msrb.mxu2 %v3269_v30 }
  0x6e   : > { %1260 = vmatpush.bf16.msra.mxu3 %v3197_v36 }
  0x6f   : > { %1246 = vmatpush.bf16.msra.mxu1 %v3133_v42 }
  0x70   : > { %1233 = vmatpush.bf16.msra.mxu0 %v3061_v46 }
  0x71   : > { %1274 = vmatpush.bf16.msrb.mxu2 %v3261_v43 }
  0x72   : > { %1261 = vmatpush.bf16.msra.mxu3 %v3189_v51 }
  0x73   : > { %1247 = vmatpush.bf16.msra.mxu1 %v3125_v60 }
  0x74   : > { %1234 = vmatpush.bf16.msra.mxu0 %v3053_v62 }
  0x75   : > { %1275 = vmatpush.bf16.msrb.mxu2 %v3253_v61 }
  0x76   : > { %1262 = vmatpush.bf16.msra.mxu3 %v3181_v2 }
  0x77   : > { %1248 = vmatpush.bf16.msra.mxu1 %v3117_v7  ;;  %1235 = vmatmul.bf16.vlgmr.msra.gmra.mxu0 %v4615_v53  ;;  %v3949_v53 = vld [vmem:[%s6072_s4 + $0x28] sm:$0xff] }
  0x78   : > { %1290 = vmatpush.bf16.msrb.mxu0 %v3309_v6 }
  0x79   : > { %1263 = vmatmul.bf16.vlgmr.msra.gmra.mxu3 %v4825_v37  ;;  %1276 = vmatpush.bf16.msrb.mxu2 %v3245_v8  ;;  %v3946_v37 = vld [vmem:[%s6072_s4 + $0x10] sm:$0xff] }
  0x7a   : > { %1249 = vmatmul.bf16.vlgmr.msra.gmra.mxu1 %v4627_v63  ;;  %v3948_v63 = vld [vmem:[%s6072_s4 + $0x20] sm:$0xff]  ;;  %1449 = vmatpush.bf16.msrb.mxu3 %v3959_v22 }
  0x7b   : > { %1435 = vmatpush.bf16.msrb.mxu1 %v3951_v9 }
  0x7c   : > { %1277 = vmatmul.bf16.vlgmr.msrb.gmra.mxu2 %v4836_v44  ;;  %v3945_v44 = vld [vmem:[%s6072_s4 + $0x8] sm:$0xff] }
  0x7e   : > { %1450 = vmatpush.bf16.msrb.mxu3 %v3958_v27 }
  0x7f   : > { %1436 = vmatpush.bf16.msrb.mxu1 %v3950_v4 }
  0x82   : > { %1451 = vmatpush.bf16.msrb.mxu3 %v3957_v33  ;;  %v4119_v33 = vld [vmem:[%s6075_s7] ss:$0 sm:$0xff] }
  0x83   : > { %1437 = vmatpush.bf16.msrb.mxu1 %v3949_v53 }
  0x86   : > { %1452 = vmatpush.bf16.msrb.mxu3 %v3956_v38 }
  0x87   : > { %3311 = vmatmul.msk.bf16.vlgmr.msrb.gmra.mxu0 %vm1097_vm0, %v4727_v48  ;;  %1438 = vmatpush.bf16.msrb.mxu1 %v3948_v63  ;;  %v3947_v48 = vld [vmem:[%s6072_s4 + $0x18] sm:$0xff] }
  0x8a   : > { %1453 = vmatpush.bf16.msrb.mxu3 %v3955_v45 }
  0x8b   : > { %1439 = vmatpush.bf16.msrb.mxu1 %v3947_v48 }
  0x8e   : > { %1454 = vmatpush.bf16.msrb.mxu3 %v3954_v50 }
  0x8f   : > { %1440 = vmatpush.bf16.msrb.mxu1 %v3946_v37 }
  0x92   : > { %1455 = vmatpush.bf16.msrb.mxu3 %v3953_v54 }
  0x93   : > { %1441 = vmatpush.bf16.msrb.mxu1 %v3945_v44 }
  0x96   : > { %1456 = vmatpush.bf16.msrb.mxu3 %v3952_v56  ;;  %v4068_v56 = vld [vmem:[%s6078_s10 + $0x360] sm:$0xf0] }
  0x97   : > { %1442 = vmatpush.bf16.msrb.mxu1 %v3944_v12 }
  0xb4   : > { %v1110_v11 = vpop.f32.mrf.mxu0 }
  0xb5   : > { %v1111_v15 = vadd.f32 %v1110_v11, %v603_v14 }
  0xb7   : > { %v1124_v13 = vpop.f32.mrf.mxu1 }
  0xb8   : > { %v1125_v18 = vadd.f32 %v1124_v13, %v1111_v15 }
  0xbb   : > { %v1138_v59 = vpop.f32.mrf.mxu2 }
  0xbc   : > { %v1112_v16 = vpop.f32.mrf.mxu0  ;;  %v1152_v19 = vpop.f32.mrf.mxu3  ;;  %v1139_v23 = vadd.f32 %v1138_v59, %v1125_v18 }
  0xbd   : > { %v1113_v21 = vadd.f32 %v1112_v16, %v603_v14 }
  0xbe   : > { %v1153_v28 = vadd.f32 %v1152_v19, %v1139_v23  ;;  %v1466_v19 = vld [vmem:[%s6074_s6] sm:$0xf] }
  0xbf   : > { %v1126_v20 = vpop.f32.mrf.mxu1  ;;  %v4118_v23 = vld [vmem:[%s6073_s5] ss:$0 sm:$0xff] }
  0xc0   : > { %v1127_v24 = vadd.f32 %v1126_v20, %v1113_v21  ;;  %v1477_v20 = vsel %vm1475_vm1, %v1466_v19, 0  ;;  %v4047_v19 = vld [vmem:[%s6078_s10 + $0x2b8] sm:$0xf0] }
  0xc1   : > { %1486 = vmatpush.bf16.msra.mxu0 %v1477_v20  ;;  %v4044_v20 = vld [vmem:[%s6078_s10 + $0x2a4] sm:$0xf] }
  0xc3   : > { %v1140_v17 = vpop.f32.mrf.mxu2 }
  0xc4   : > { %v1141_v30 = vadd.f32 %v1140_v17, %v1127_v24  ;;  %v1154_v32 = vpop.f32.mrf.mxu3 }
  0xc6   : > { %v1155_v34 = vadd.f32 %v1154_v32, %v1141_v30 }
  0xcb   : > { %v1194_v26 = vpop.f32.mrf.mxu2 }
  0xd3   : > { %v1196_v41 = vpop.f32.mrf.mxu2 }
  0xd4   : > { %v1166_v25 = vpop.f32.mrf.mxu0 }
  0xd5   : > { %v1167_v31 = vadd.f32 %v1166_v25, %v1153_v28 }
  0xd7   : > { %v1180_v29 = vpop.f32.mrf.mxu1 }
  0xd8   : > { %v1181_v35 = vadd.f32 %v1180_v29, %v1167_v31 }
  0xda   : > { %v1195_v42 = vadd.f32 %v1194_v26, %v1181_v35 }
  0xdc   : > { %v1168_v36 = vpop.f32.mrf.mxu0  ;;  %v1297_v47 = vmax.f32 %v1195_v42, 0.0  ;;  %v1208_v52 = vpop.f32.mrf.mxu3 }
  0xdd   : > { %v1169_v39 = vadd.f32 %v1168_v36, %v1155_v34  ;;  %v1209_v62 = vadd.f32 %v1208_v52, %v604_v57 }
  0xdf   : > { %v1182_v40 = vpop.f32.mrf.mxu1  ;;  %v1222_v55 = vpop.f32.mrf.mxu2 }
  0xe0   : > { %v1183_v43 = vadd.f32 %v1182_v40, %v1169_v39  ;;  %v1223_v1 = vadd.f32 %v1222_v55, %v1209_v62  ;;  %v3801_v55 = vld [vmem:[%s6078_s10 + $0x348] sm:$0xf]  ;;  %v4061_v62 = vld [vmem:[%s6078_s10 + $0x328] sm:$0xf0] }
  0xe2   : > { %v1197_v46 = vadd.f32 %v1196_v41, %v1183_v43 }
  0xe4   : > { %v1299_v49 = vmax.f32 %v1197_v46, 0.0  ;;  %v1210_v58 = vpop.f32.mrf.mxu3  ;;  %v1514_v46 = vld [vmem:[%s6076_s8] sm:$0xff] }
  0xe5   : > { %v1211_v2 = vadd.f32 %v1210_v58, %v604_v57  ;;  %v4065_v57 = vld [vmem:[%s6078_s10 + $0x34c] sm:$0xf]  ;;  %v3802_v58 = vor.u32 %v4068_v56, %v3801_v55  ;;  %v3467_v56 = vld [vmem:[%s6078_s10 + $0xc4] sm:$0xf0] }
  0xe6   : > { %v1301_v51 = vpack.c.bf16 %v1299_v49, %v1297_v47  ;;  %v1522_v47 = vunpack.c.l.b16 %v1514_v46  ;;  %v1523_v49 = vunpack.c.h.b16 %v1514_v46  ;;  %v3981_v55 = vld [vmem:[%s6078_s10 + $0xac] sm:$0xf] }
  0xe7   : > { %v1224_v61 = vpop.f32.mrf.mxu2 }
  0xe8   : > { %1443 = vmatmul.bf16.vlgmr.msrb.gmra.mxu1 %v1301_v51  ;;  %v1225_v7 = vadd.f32 %v1224_v61, %v1211_v2  ;;  %v1524_v50 = vpack.c.b16 %v1522_v47, %v1522_v47  ;;  %v1525_v51 = vpack.c.b16 %v1523_v49, %v1523_v49  ;;  %v3773_v61 = vld [vmem:[%s6078_s10 + $0x310] sm:$0xf] }
  0xe9   : > { %v3775_v2 = vld [vmem:[%s6078_s10 + $0x32c] sm:$0xf0] }
  0xea   : > { %v1530_v52 = vsel %vm1475_vm1, %v1524_v50, 0  ;;  %v1533_v54 = vsel %vm1475_vm1, %v1525_v51, 0  ;;  %v3465_v50 = vld [vmem:[%s6078_s10 + $0xa8] sm:$0xf] }
  0xeb   : > { %1542 = vmatpush.bf16.msra.mxu2 %v1530_v52  ;;  %1556 = vmatpush.bf16.msrb.mxu0 %v1533_v54  ;;  %v3984_v54 = vld [vmem:[%s6078_s10 + $0xc0] sm:$0xf0] }
  0xef   : > { %2303 = vmatpush.bf16.msrb.mxu2 %v3802_v58  ;;  %v4033_v58 = vld [vmem:[%s6078_s10 + $0x248] sm:$0xf0] }
  0xf4   : > { %v1236_v60 = vpop.f32.mrf.mxu0 }
  0xf5   : > { %v1237_v8 = vadd.f32 %v1236_v60, %v1223_v1  ;;  %v3803_v60 = vld [vmem:[%s6078_s10 + $0x364] sm:$0xf0]  ;;  %v4058_v1 = vld [vmem:[%s6078_s10 + $0x314] sm:$0xf] }
  0xf7   : > { %v1250_v0 = vpop.f32.mrf.mxu1 }
  0xf8   : > { %v1251_v53 = vadd.f32 %v1250_v0, %v1237_v8  ;;  %v3806_v0 = vor.u32 %v4065_v57, %v3803_v60  ;;  %v3579_v8 = vld [vmem:[%s6078_s10 + $0x1a4] sm:$0xf0] }
  0xfc   : > { %v1264_v3 = vpop.f32.mrf.mxu3  ;;  %v1238_v5 = vpop.f32.mrf.mxu0 }
  0xfd   : > { %v1239_v9 = vadd.f32 %v1238_v5, %v1225_v7  ;;  %v1265_v37 = vadd.f32 %v1264_v3, %v1251_v53  ;;  %v3577_v3 = vld [vmem:[%s6078_s10 + $0x188] sm:$0xf]  ;;  %v3774_v5 = vor.u32 %v4061_v62, %v3773_v61  ;;  %v4009_v7 = vld [vmem:[%s6078_s10 + $0x18c] sm:$0xf]  ;;  %v4030_v61 = vld [vmem:[%s6078_s10 + $0x234] sm:$0xf] }
  0xfe   : > { %v3582_v53 = vor.u32 %v4009_v7, %v3579_v8  ;;  %v3663_v62 = vld [vmem:[%s6078_s10 + $0x24c] sm:$0xf0] }
  0xff   : > { %v1278_v6 = vpop.f32.mrf.mxu2  ;;  %v1252_v4 = vpop.f32.mrf.mxu1  ;;  %2304 = vmatpush.bf16.msrb.mxu2 %v3774_v5  ;;  %v3977_v5 = vld [vmem:[%s6078_s10 + $0x88] sm:$0xf0]  ;;  %v3439_v7 = vld [vmem:[%s6078_s10 + $0x8c] sm:$0xf0]  ;;  %v3666_v8 = vor.u32 %v4030_v61, %v3663_v62  ;;  %v3559_v61 = vld [vmem:[%s6078_s10 + $0x174] sm:$0xf0] }
 0x100   : > { %v1253_v44 = vadd.f32 %v1252_v4, %v1239_v9  ;;  %v1279_v59 = vadd.f32 %v1278_v6, %v1265_v37  ;;  %v4012_v6 = vld [vmem:[%s6078_s10 + $0x1a0] sm:$0xf0]  ;;  %v3778_v9 = vor.u32 %v4058_v1, %v3775_v2  ;;  %v4051_v37 = vld [vmem:[%s6078_s10 + $0x2dc] sm:$0xf]  ;;  %2317 = vmatpush.bf16.msra.mxu3 %v3582_v53  ;;  %v3470_v1 = vor.u32 %v3981_v55, %v3467_v56  ;;  %v3437_v2 = vld [vmem:[%s6078_s10 + $0x70] sm:$0xf] }
 0x101   : > { %v3578_v4 = vor.u32 %v4012_v6, %v3577_v3  ;;  %v3974_v6 = vld [vmem:[%s6078_s10 + $0x74] sm:$0xf]  ;;  %v1493_v53 = vld [vmem:[%s472_s27] sm:$0xff] }
 0x103   : > { %2289 = vmatpush.bf16.msra.mxu1 %v3578_v4  ;;  %v4026_v4 = vld [vmem:[%s6078_s10 + $0x210] sm:$0xf0] }
 0x104   : > { %v1266_v63 = vpop.f32.mrf.mxu3  ;;  %v1292_v48 = vpop.f32.mrf.mxu0 }
 0x105   : > { %v1267_v10 = vadd.f32 %v1266_v63, %v1253_v44  ;;  %v1293_v12 = vadd.f32 %v1292_v48, %v1279_v59  ;;  %v3745_v63 = vld [vmem:[%s6078_s10 + $0x2d8] sm:$0xf]  ;;  %v4054_v48 = vld [vmem:[%s6078_s10 + $0x2f0] sm:$0xf0] }
 0x106   : > { %v3747_v44 = vld [vmem:[%s6078_s10 + $0x2f4] sm:$0xf0] }
 0x107   : > { %v1280_v11 = vpop.f32.mrf.mxu2  ;;  %v1298_v16 = vmax.f32 %v1293_v12, 0.0 }
 0x108   : > { %v1281_v13 = vadd.f32 %v1280_v11, %v1267_v10  ;;  %v3549_v10 = vld [vmem:[%s6078_s10 + $0x150] sm:$0xf]  ;;  %v4005_v11 = vld [vmem:[%s6078_s10 + $0x168] sm:$0xf0] }
 0x109   : > { %v3550_v12 = vor.u32 %v4005_v11, %v3549_v10  ;;  %v3442_v10 = vor.u32 %v3974_v6, %v3439_v7  ;;  %v3409_v11 = vld [vmem:[%s6078_s10 + $0x38] sm:$0xf] }
 0x10b   : > { %2290 = vmatpush.bf16.msra.mxu1 %v3550_v12  ;;  %v3970_v12 = vld [vmem:[%s6078_s10 + $0x50] sm:$0xf0] }
 0x10c   : > { %v1294_v14 = vpop.f32.mrf.mxu0 }
 0x10d   : > { %v1295_v15 = vadd.f32 %v1294_v14, %v1281_v13  ;;  %v4002_v13 = vld [vmem:[%s6078_s10 + $0x154] sm:$0xf]  ;;  %v3551_v14 = vld [vmem:[%s6078_s10 + $0x16c] sm:$0xf0] }
 0x10f   : > { %v1300_v17 = vmax.f32 %v1295_v15, 0.0 }
 0x111   : > { %v1302_v18 = vpack.c.bf16 %v1300_v17, %v1298_v16  ;;  %v3746_v16 = vor.u32 %v4054_v48, %v3745_v63  ;;  %v3554_v17 = vor.u32 %v4002_v13, %v3551_v14  ;;  %v4023_v63 = vld [vmem:[%s6078_s10 + $0x1fc] sm:$0xf]  ;;  %v3635_v48 = vld [vmem:[%s6078_s10 + $0x214] sm:$0xf0] }
 0x112   : > { %v3967_v13 = vld [vmem:[%s6078_s10 + $0x3c] sm:$0xf]  ;;  %v3411_v14 = vld [vmem:[%s6078_s10 + $0x54] sm:$0xf0] }
 0x113   : > { %1457 = vmatmul.bf16.vlgmr.msrb.gmra.mxu3 %v1302_v18  ;;  %v3717_v18 = vld [vmem:[%s6078_s10 + $0x2a0] sm:$0xf]  ;;  %2305 = vmatpush.bf16.msrb.mxu2 %v3746_v16  ;;  %v3638_v16 = vor.u32 %v4023_v63, %v3635_v48  ;;  %v3727_v63 = vld [vmem:[%s6078_s10 + $0x2c4] sm:$0xf0] }
 0x114   : > { %2318 = vmatpush.bf16.msra.mxu3 %v3554_v17  ;;  %v3605_v17 = vld [vmem:[%s6078_s10 + $0x1c0] sm:$0xf] }
 0x165   : > { %v1444_v21 = vpop.f32.mrf.mxu1 }
 0x166   : > { %v1445_v25 = vadd.f32 %v4118_v23, %v1444_v21 }
 0x16d   : > { %v1446_v24 = vpop.f32.mrf.mxu1 }
 0x16e   : > { %v1447_v26 = vadd.f32 %v4118_v23, %v1446_v24  ;;  %v3521_v23 = vld [vmem:[%s6078_s10 + $0x118] sm:$0xf]  ;;  %v3998_v24 = vld [vmem:[%s6078_s10 + $0x130] sm:$0xf0] }
 0x196   : > { %v1458_v22 = vpop.f32.mrf.mxu3 }
 0x197   : > { %v5065_v27 = vadd.f32 %v1458_v22, %v1445_v25  ;;  %v3750_v22 = vor.u32 %v4051_v37, %v3747_v44  ;;  %v3995_v25 = vld [vmem:[%s6078_s10 + $0x11c] sm:$0xf]  ;;  %v1494_v37 = vld [vmem:[%s472_s27 + $0x8] sm:$0xff]  ;;  %v3438_v44 = vor.u32 %v3977_v5, %v3437_v2  ;;  %v4052_v2 = vld [vmem:[%s6078_s10 + $0x2e4] sm:$0xf]  ;;  %s4196_s27 = scalar_lea.hbm %s4195_s22, 56 }
 0x198   : > { %p4197_p11 = scmp.ne.s32.totalorder %s4195_s22, %s4196_s27 }
 0x199   : > { %v1463_v30 = vmax.f32 %v5065_v27, 0.0  ;;  %v3523_v27 = vld [vmem:[%s6078_s10 + $0x134] sm:$0xf0] }
 0x19a   : > { %p4198_p12 = pnand %p4197_p11, %p4356_p5 }
 0x19c   : > { %p4199_p13 = pneg %p4198_p12 }
 0x19e   : > { %v1460_v28 = vpop.f32.mrf.mxu3 }
 0x19f   : > { %v5067_v29 = vadd.f32 %v1460_v28, %v1447_v26  ;;  %v3719_v26 = vld [vmem:[%s6078_s10 + $0x2bc] sm:$0xf0]  ;;  %v3522_v28 = vor.u32 %v3998_v24, %v3521_v23  ;;  %v4069_v24 = vld [vmem:[%s6078_s10 + $0x368] sm:$0xf0] }
 0x1a1   : > { %v1464_v31 = vmax.f32 %v5067_v29, 0.0  ;;  %2291 = vmatpush.bf16.msra.mxu1 %v3522_v28  ;;  %v3414_v28 = vor.u32 %v3967_v13, %v3411_v14  ;;  %v3697_v14 = vld [vmem:[%s6078_s10 + $0x270] sm:$0xf] }
 0x1a3   : > { %v1465_v32 = vpack.c.bf16 %v1464_v31, %v1463_v30 }
 0x1a5   : > { %3376 = vmatmul.msk.bf16.vlgmr.msra.gmra.mxu0 %vm1471_vm2, %v1465_v32  ;;  %v3718_v32 = vor.u32 %v4047_v19, %v3717_v18  ;;  %v4019_v18 = vld [vmem:[%s6078_s10 + $0x1d8] sm:$0xf0] }
 0x1a6   : > { %2331 = vmatpush.bf16.msra.mxu0 %v3806_v0  ;;  %v3466_v0 = vor.u32 %v3984_v54, %v3465_v50  ;;  %v4062_v50 = vld [vmem:[%s6078_s10 + $0x330] sm:$0xf0]  ;;  %v3783_v54 = vld [vmem:[%s6078_s10 + $0x334] sm:$0xf0] }
 0x1a7   : > { %2306 = vmatpush.bf16.msrb.mxu2 %v3718_v32  ;;  %v3381_v32 = vld [vmem:[%s6078_s10] sm:$0xf] }
 0x1aa   : > { %2332 = vmatpush.bf16.msra.mxu0 %v3778_v9  ;;  %v3633_v9 = vld [vmem:[%s6078_s10 + $0x1f8] sm:$0xf] }
 0x1ae   : > { %2333 = vmatpush.bf16.msra.mxu0 %v3750_v22  ;;  %v3809_v22 = vld [vmem:[%s6078_s10 + $0x350] sm:$0xf] }
 0x222   : > { %v1488_v34 = vpop.f32.mrf.mxu0 }
 0x223   : > { %v5079_v35 = vadd.f32 %v4119_v33, %v1488_v34  ;;  %v3991_v34 = vld [vmem:[%s6078_s10 + $0xf8] sm:$0xf0] }
 0x225   : > { %v1495_v36 = vmul.f32 0.5, %v5079_v35  ;;  %2770 = vrot.lane.b32.xlu1 %v5079_v35, %s4244_s17 }
 0x227   : > { %v1497_v38 = vmul.f32 1.442695, %v1495_v36  ;;  %v3988_v36 = vld [vmem:[%s6078_s10 + $0xe4] sm:$0xf] }
 0x229   : > { %4120 = vpow2.f32 %v1497_v38  ;;  %v3722_v38 = vor.u32 %v4044_v20, %v3719_v26  ;;  %v4016_v20 = vld [vmem:[%s6078_s10 + $0x1c4] sm:$0xf]  ;;  %v4066_v26 = vld [vmem:[%s6078_s10 + $0x354] sm:$0xf] }
 0x22a   : > { %v1490_v39 = vpop.f32.mrf.mxu0 }
 0x22b   : > { %v5083_v40 = vadd.f32 %v4119_v33, %v1490_v39  ;;  %v3493_v33 = vld [vmem:[%s6078_s10 + $0xe0] sm:$0xf]  ;;  %v3689_v39 = vld [vmem:[%s6078_s10 + $0x268] sm:$0xf]  ;;  %2334 = vmatpush.bf16.msra.mxu0 %v3722_v38 }
 0x22c   : > { %v3494_v47 = vor.u32 %v3991_v34, %v3493_v33  ;;  %v3963_v33 = vld [vmem:[%s6078_s10 + $0x18] sm:$0xf0]  ;;  %v3960_v34 = vld [vmem:[%s6078_s10 + $0x4] sm:$0xf] }
 0x22d   : > { %v1496_v41 = vmul.f32 0.5, %v5083_v40  ;;  %2772 = vrot.lane.b32.xlu1 %v5083_v40, %s4244_s17 }
 0x22e   : > { %2292 = vmatpush.bf16.msra.mxu1 %v3494_v47 }
 0x22f   : > { %v4121_v42 = vpop.eup %4120  ;;  %v1499_v43 = vmul.f32 1.442695, %v1496_v41  ;;  %v4040_v41 = vld [vmem:[%s6078_s10 + $0x280] sm:$0xf0] }
 0x230   : > { %1503 = vrot.lane.b32.xlu0 %v4121_v42, %s4245_s25  ;;  %v3495_v42 = vld [vmem:[%s6078_s10 + $0xfc] sm:$0xf0]  ;;  %v3690_v52 = vor.u32 %v4040_v41, %v3689_v39  ;;  %v3585_v41 = vld [vmem:[%s6078_s10 + $0x190] sm:$0xf] }
 0x231   : > { %4122 = vpow2.f32 %v1499_v43  ;;  %v4037_v43 = vld [vmem:[%s6078_s10 + $0x26c] sm:$0xf]  ;;  %v3498_v49 = vor.u32 %v3988_v36, %v3495_v42  ;;  %v3383_v39 = vld [vmem:[%s6078_s10 + $0x1c] sm:$0xf0] }
 0x232   : > { %2307 = vmatpush.bf16.msrb.mxu2 %v3690_v52  ;;  %2293 = vmatpush.bf16.msra.mxu1 %v3466_v0  ;;  %v4013_v42 = vld [vmem:[%s6078_s10 + $0x1a8] sm:$0xf0]  ;;  %v4059_v52 = vld [vmem:[%s6078_s10 + $0x31c] sm:$0xf]  ;;  %v3386_v55 = vor.u32 %v3960_v34, %v3383_v39  ;;  %v3753_v0 = vld [vmem:[%s6078_s10 + $0x2e0] sm:$0xf] }
 0x233   : > { %v3586_v56 = vor.u32 %v4013_v42, %v3585_v41  ;;  %v3786_v62 = vor.u32 %v4059_v52, %v3783_v54  ;;  %v3473_v34 = vld [vmem:[%s6078_s10 + $0xb0] sm:$0xf]  ;;  %v3982_v39 = vld [vmem:[%s6078_s10 + $0xb4] sm:$0xf]  ;;  %v3975_v52 = vld [vmem:[%s6078_s10 + $0x7c] sm:$0xf] }
 0x234   : > { %v3475_v41 = vld [vmem:[%s6078_s10 + $0xcc] sm:$0xf0]  ;;  %v3447_v54 = vld [vmem:[%s6078_s10 + $0x94] sm:$0xf0] }
 0x235   : > { %v3478_v42 = vor.u32 %v3982_v39, %v3475_v41  ;;  %v4056_v39 = vld [vmem:[%s6078_s10 + $0x300] sm:$0xf0] }
 0x236   : > { %2294 = vmatpush.bf16.msra.mxu1 %v3438_v44  ;;  %v3529_v44 = vld [vmem:[%s6078_s10 + $0x120] sm:$0xf] }
 0x237   : > { %v4123_v45 = vpop.eup %4122 }
 0x238   : > { %1505 = vrot.lane.b32.xlu0 %v4123_v45, %s4245_s25  ;;  %v3691_v45 = vld [vmem:[%s6078_s10 + $0x284] sm:$0xf0] }
 0x239   : > { %v3694_v29 = vor.u32 %v4037_v43, %v3691_v45  ;;  %v3810_v45 = vor.u32 %v4069_v24, %v3809_v22  ;;  %v3503_v24 = vld [vmem:[%s6078_s10 + $0x104] sm:$0xf0] }
 0x23b   : > { %2335 = vmatpush.bf16.msra.mxu0 %v3694_v29  ;;  %v3557_v29 = vld [vmem:[%s6078_s10 + $0x158] sm:$0xf] }
 0x23f   : > { %2336 = vmatpush.bf16.msra.mxu0 %v3666_v8 }
 0x243   : > { %2337 = vmatpush.bf16.msra.mxu0 %v3638_v16 }
 0x297   : > { %v2771_v59 = vpop.permute.xlu1 %2770 }
 0x298   : > { %v2776_v15 = vsel %vm1471_vm2, %v1463_v30, %v2771_v59  ;;  %v3526_v30 = vor.u32 %v3995_v25, %v3523_v27  ;;  %v3410_v25 = vor.u32 %v3970_v12, %v3409_v11  ;;  %v3811_v27 = vld [vmem:[%s6078_s10 + $0x36c] sm:$0xf0]  ;;  %v3531_v12 = vld [vmem:[%s6078_s10 + $0x13c] sm:$0xf0] }
 0x299   : > { %v2778_v21 = vsel %vm1097_vm0, %v2776_v15, %v2771_v59  ;;  %v3634_v59 = vor.u32 %v4026_v4, %v3633_v9  ;;  %v3814_v47 = vor.u32 %v4066_v26, %v3811_v27  ;;  %v3725_v9 = vld [vmem:[%s6078_s10 + $0x2a8] sm:$0xf]  ;;  %v4048_v4 = vld [vmem:[%s6078_s10 + $0x2c0] sm:$0xf0]  ;;  %v3669_v26 = vld [vmem:[%s6078_s10 + $0x238] sm:$0xf] }
 0x29a   : > { %2781 = vst.msk [vmem:[%s5152_s30] sm:$0xff] %vm2780_vm3, %v2778_v21  ;;  %2319 = vmatpush.bf16.msra.mxu3 %v3526_v30  ;;  %v3607_v21 = vld [vmem:[%s6078_s10 + $0x1dc] sm:$0xf0]  ;;  %v3606_v30 = vor.u32 %v4019_v18, %v3605_v17  ;;  %2295 = vmatpush.bf16.msra.mxu1 %v3410_v25  ;;  %v3726_v48 = vor.u32 %v4048_v4, %v3725_v9  ;;  %v4038_v17 = vld [vmem:[%s6078_s10 + $0x274] sm:$0xf] }
 0x29b   : > { %v3610_v43 = vor.u32 %v4016_v20, %v3607_v21  ;;  %v3699_v18 = vld [vmem:[%s6078_s10 + $0x28c] sm:$0xf0]  ;;  %v3501_v20 = vld [vmem:[%s6078_s10 + $0xe8] sm:$0xf]  ;;  %v3992_v21 = vld [vmem:[%s6078_s10 + $0x100] sm:$0xf0] }
 0x29c   : > { %v3502_v22 = vor.u32 %v3992_v21, %v3501_v20  ;;  %v4034_v27 = vld [vmem:[%s6078_s10 + $0x250] sm:$0xf0]  ;;  %v3391_v9 = vld [vmem:[%s6078_s10 + $0x24] sm:$0xf0]  ;;  %v3789_v20 = vld [vmem:[%s6078_s10 + $0x320] sm:$0xf] }
 0x29d   : > { %2338 = vmatpush.bf16.msra.mxu0 %v3610_v43  ;;  %v3641_v43 = vld [vmem:[%s6078_s10 + $0x200] sm:$0xf] }
 0x29e   : > { %2320 = vmatpush.bf16.msra.mxu3 %v3498_v49  ;;  %v3781_v49 = vld [vmem:[%s6078_s10 + $0x318] sm:$0xf] }
 0x29f   : > { %v2773_v46 = vpop.permute.xlu1 %2772 }
 0x2a0   : > { %v2777_v51 = vsel %vm1471_vm2, %v1464_v31, %v2773_v46  ;;  %v3661_v31 = vld [vmem:[%s6078_s10 + $0x230] sm:$0xf] }
 0x2a1   : > { %v2779_v57 = vsel %vm1097_vm0, %v2777_v51, %v2773_v46  ;;  %v3662_v3 = vor.u32 %v4033_v58, %v3661_v31  ;;  %v3382_v51 = vor.u32 %v3963_v33, %v3381_v32  ;;  %v4006_v31 = vld [vmem:[%s6078_s10 + $0x170] sm:$0xf0]  ;;  %v3782_v58 = vor.u32 %v4062_v50, %v3781_v49  ;;  %v3671_v32 = vld [vmem:[%s6078_s10 + $0x254] sm:$0xf0] }
 0x2a2   : > { %2782 = vst.msk [vmem:[%s5152_s30 + $0x8] sm:$0xff] %vm2780_vm3, %v2779_v57  ;;  %v1504_v60 = vpop.permute.xlu0 %1503  ;;  %2321 = vmatpush.bf16.msra.mxu3 %v3470_v1  ;;  %v4055_v1 = vld [vmem:[%s6078_s10 + $0x2f8] sm:$0xf0]  ;;  %v3558_v5 = vor.u32 %v4006_v31, %v3557_v29  ;;  %v3445_v49 = vld [vmem:[%s6078_s10 + $0x78] sm:$0xf]  ;;  %s458_s30 = sand.u32 1, %s4234_s26  }
 0x2a3   : > { %2308 = vmatpush.bf16.msrb.mxu2 %v3662_v3  ;;  %v1509_v15 = vmul.f32 %v1504_v60, %v1493_v53  ;;  %v4003_v60 = vld [vmem:[%s6078_s10 + $0x15c] sm:$0xf]  ;;  %2296 = vmatpush.bf16.msra.mxu1 %v3382_v51  ;;  %v3755_v3 = vld [vmem:[%s6078_s10 + $0x2fc] sm:$0xf0]  ;;  %v3754_v7 = vor.u32 %v4055_v1, %v3753_v0  ;;  %v4045_v53 = vld [vmem:[%s6078_s10 + $0x2ac] sm:$0xf] }
 0x2a4   : > { %v3562_v6 = vor.u32 %v4003_v60, %v3559_v61  ;;  %v3758_v8 = vor.u32 %v4052_v2, %v3755_v3  ;;  %v3978_v50 = vld [vmem:[%s6078_s10 + $0x90] sm:$0xf0]  ;;  %v4017_v31 = vld [vmem:[%s6078_s10 + $0x1cc] sm:$0xf]  ;;  %v3417_v61 = vld [vmem:[%s6078_s10 + $0x40] sm:$0xf] }
 0x2a5   : > { %v1511_v36 = vadd.f32 %v1509_v15, %v5079_v35  ;;  %v4010_v35 = vld [vmem:[%s6078_s10 + $0x194] sm:$0xf]  ;;  %v4041_v15 = vld [vmem:[%s6078_s10 + $0x288] sm:$0xf0]  ;;  %v3446_v51 = vor.u32 %v3978_v50, %v3445_v49  ;;  %v3968_v1 = vld [vmem:[%s6078_s10 + $0x44] sm:$0xf] }
 0x2a6   : > { %2322 = vmatpush.bf16.msra.mxu3 %v3442_v10  ;;  %v3999_v10 = vld [vmem:[%s6078_s10 + $0x138] sm:$0xf0]  ;;  %v3698_v16 = vor.u32 %v4041_v15, %v3697_v14  ;;  %v3419_v2 = vld [vmem:[%s6078_s10 + $0x5c] sm:$0xf0]  ;;  %v3819_v15 = vld [vmem:[%s6078_s10 + $0x374] sm:$0xf0] }
 0x2a7   : > { %2309 = vmatpush.bf16.msrb.mxu2 %v3634_v59  ;;  %2345 = vmatpush.bf16.msrb.mxu1 %v3586_v56  ;;  %v3530_v11 = vor.u32 %v3999_v10, %v3529_v44  ;;  %v3996_v59 = vld [vmem:[%s6078_s10 + $0x124] sm:$0xf]  ;;  %v3613_v56 = vld [vmem:[%s6078_s10 + $0x1c8] sm:$0xf]  ;;  %v3422_v3 = vor.u32 %v3968_v1, %v3419_v2  ;;  %v4067_v14 = vld [vmem:[%s6078_s10 + $0x35c] sm:$0xf] }
 0x2a8   : > { %v3534_v13 = vor.u32 %v3996_v59, %v3531_v12  ;;  %v3817_v59 = vld [vmem:[%s6078_s10 + $0x358] sm:$0xf]  ;;  %v4007_v49 = vld [vmem:[%s6078_s10 + $0x178] sm:$0xf0]  ;;  %v4004_v50 = vld [vmem:[%s6078_s10 + $0x164] sm:$0xf] }
 0x2a9   : > { %s5867_s25 = smul.u32 56, %s458_s30  ;;  %s2789_s23 = scalar_lea.sflag [#allocation3], %s458_s30 }
 0x2aa   : > { %v1506_v19 = vpop.permute.xlu0 %1505  ;;  %2323 = vmatpush.bf16.msra.mxu3 %v3414_v28  ;;  %v3670_v28 = vor.u32 %v4034_v27, %v3669_v26  ;;  %v3593_v27 = vld [vmem:[%s6078_s10 + $0x198] sm:$0xf] }
 0x2ab   : > { %v1510_v23 = vmul.f32 %v1506_v19, %v1494_v37  ;;  %2310 = vmatpush.bf16.msrb.mxu2 %v3606_v30  ;;  %2346 = vmatpush.bf16.msrb.mxu1 %v3558_v5  ;;  %v3730_v37 = vor.u32 %v4045_v53, %v3727_v63  ;;  %v3702_v19 = vor.u32 %v4038_v17, %v3699_v18  ;;  %v4031_v30 = vld [vmem:[%s6078_s10 + $0x23c] sm:$0xf]  ;;  %v3389_v5 = vld [vmem:[%s6078_s10 + $0x8] sm:$0xf]  ;;  %v1515_v53 = vld [vmem:[%s6077_s9] sm:$0x3] }
 0x2ac   : > { %v3674_v33 = vor.u32 %v4031_v30, %v3671_v32  ;;  %v1517_v10 = vperm.slane %v1515_v53, 0  ;;  %v4014_v30 = vld [vmem:[%s6078_s10 + $0x1b0] sm:$0xf0]  ;;  %v4011_v32 = vld [vmem:[%s6078_s10 + $0x19c] sm:$0xf]  ;;  %s5895_s20 = scalar_lea.vmem [#allocation2], %s5867_s25 }
 0x2ad   : > { %v1512_v38 = vadd.f32 %v1510_v23, %v5083_v40  ;;  %v3587_v40 = vld [vmem:[%s6078_s10 + $0x1ac] sm:$0xf0]  ;;  %v3989_v23 = vld [vmem:[%s6078_s10 + $0xec] sm:$0xf]  ;;  %s2806_s29 = sshll.u32 %s5895_s20, 4  ;;  %s4200_s25 = scalar_lea.hbm %s6081_s13, 112  ;;  %s2807_s29 = int_to_ptr.vmem [resolvable:$true] %s2806_s29 }
 0x2ae   : > { %v3590_v57 = vor.u32 %v4010_v35, %v3587_v40  ;;  %2324 = vmatpush.bf16.msra.mxu3 %v3386_v55  ;;  %v3506_v25 = vor.u32 %v3989_v23, %v3503_v24  ;;  %v4024_v40 = vld [vmem:[%s6078_s10 + $0x204] sm:$0xf]  ;;  %v3450_v55 = vor.u32 %v3975_v52, %v3447_v54  ;;  %v4063_v23 = vld [vmem:[%s6078_s10 + $0x338] sm:$0xf0]  ;;  %p4202_p1 = scmp.lt.s32.totalorder %s4200_s25, %s4196_s27 }
 0x2af   : > { %v1513_v46 = vpack.c.bf16 %v1512_v38, %v1511_v36  ;;  %2347 = vmatpush.bf16.msrb.mxu1 %v3530_v11  ;;  %v3985_v36 = vld [vmem:[%s6078_s10 + $0xc8] sm:$0xf0]  ;;  %v4060_v24 = vld [vmem:[%s6078_s10 + $0x324] sm:$0xf] }
 0x2b0   : > { %v3474_v38 = vor.u32 %v3985_v36, %v3473_v34  ;;  %v3790_v34 = vor.u32 %v4063_v23, %v3789_v20  ;;  %v4028_v23 = vld [vmem:[%s6078_s10 + $0x220] sm:$0xf0]  ;;  %p4203_p2 = por %p4202_p1, %p4201_p0 }
 0x2b1   : > { %3377 = vmatmul.msk.bf16.vlgmr.msra.gmra.mxu2 %vm1471_vm2, %v1513_v46  ;;  %3378 = vmatmul.msk.bf16.vlgmr.msrb.gmra.mxu0 %vm1471_vm2, %v1513_v46  ;;  %v3643_v46 = vld [vmem:[%s6078_s10 + $0x21c] sm:$0xf0] }
 0x2b2   : > { %2359 = vmatpush.bf16.msra.mxu2 %v3810_v45  ;;  %2387 = vmatpush.bf16.msrb.mxu0 %v3814_v47  ;;  %v4027_v45 = vld [vmem:[%s6078_s10 + $0x218] sm:$0xf0]  ;;  %v3646_v47 = vor.u32 %v4024_v40, %v3643_v46  ;;  %v3565_v46 = vld [vmem:[%s6078_s10 + $0x160] sm:$0xf]  ;;  %p4204_p3 = pnand %p4203_p2, %p4199_p13 }
 0x2b3   : > { %2373 = vmatpush.bf16.msrb.mxu3 %v3590_v57  ;;  %2348 = vmatpush.bf16.msrb.mxu1 %v3502_v22  ;;  %v3642_v35 = vor.u32 %v4027_v45, %v3641_v43  ;;  %v4020_v57 = vld [vmem:[%s6078_s10 + $0x1e0] sm:$0xf0]  ;;  %v4053_v43 = vld [vmem:[%s6078_s10 + $0x2ec] sm:$0xf]  ;;  %v3763_v45 = vld [vmem:[%s6078_s10 + $0x304] sm:$0xf0] }
 0x2b4   : > { %v3614_v29 = vor.u32 %v4020_v57, %v3613_v56  ;;  %v3766_v54 = vor.u32 %v4053_v43, %v3763_v45  ;;  %v4049_v56 = vld [vmem:[%s6078_s10 + $0x2c8] sm:$0xf0]  ;;  %v4046_v57 = vld [vmem:[%s6078_s10 + $0x2b4] sm:$0xf] }
 0x2b6   : > { %2360 = vmatpush.bf16.msra.mxu2 %v3782_v58  ;;  %2388 = vmatpush.bf16.msrb.mxu0 %v3786_v62  ;;  %v3615_v58 = vld [vmem:[%s6078_s10 + $0x1e4] sm:$0xf0]  ;;  %v3971_v62 = vld [vmem:[%s6078_s10 + $0x58] sm:$0xf0] }
 0x2b7   : > { %2374 = vmatpush.bf16.msrb.mxu3 %v3562_v6  ;;  %2349 = vmatpush.bf16.msrb.mxu1 %v3474_v38  ;;  %v3618_v60 = vor.u32 %v4017_v31, %v3615_v58  ;;  %v3418_v0 = vor.u32 %v3971_v62, %v3417_v61  ;;  %v3964_v6 = vld [vmem:[%s6078_s10 + $0x20] sm:$0xf0]  ;;  %v3761_v38 = vld [vmem:[%s6078_s10 + $0x2e8] sm:$0xf]  ;;  %v3566_v31 = vor.u32 %v4007_v49, %v3565_v46  ;;  %v3997_v62 = vld [vmem:[%s6078_s10 + $0x12c] sm:$0xf] }
 0x2b8   : > { %v3762_v52 = vor.u32 %v4056_v39, %v3761_v38  ;;  %v4000_v61 = vld [vmem:[%s6078_s10 + $0x140] sm:$0xf0]  ;;  %v3621_v38 = vld [vmem:[%s6078_s10 + $0x1d0] sm:$0xf]  ;;  %v4021_v39 = vld [vmem:[%s6078_s10 + $0x1e8] sm:$0xf0] }
 0x2b9   : > { %v3425_v46 = vld [vmem:[%s6078_s10 + $0x48] sm:$0xf]  ;;  %v3972_v49 = vld [vmem:[%s6078_s10 + $0x60] sm:$0xf0] }
 0x2ba   : > { %2361 = vmatpush.bf16.msra.mxu2 %v3754_v7  ;;  %2389 = vmatpush.bf16.msrb.mxu0 %v3758_v8  ;;  %v3390_v7 = vor.u32 %v3964_v6, %v3389_v5  ;;  %v3961_v8 = vld [vmem:[%s6078_s10 + $0xc] sm:$0xf]  ;;  %v4042_v5 = vld [vmem:[%s6078_s10 + $0x290] sm:$0xf0]  ;;  %v4039_v6 = vld [vmem:[%s6078_s10 + $0x27c] sm:$0xf] }
 0x2bb   : > { %2375 = vmatpush.bf16.msrb.mxu3 %v3534_v13  ;;  %2350 = vmatpush.bf16.msrb.mxu1 %v3446_v51  ;;  %v3394_v4 = vor.u32 %v3961_v8, %v3391_v9  ;;  %v4070_v13 = vld [vmem:[%s6078_s10 + $0x370] sm:$0xf0]  ;;  %v3567_v51 = vld [vmem:[%s6078_s10 + $0x17c] sm:$0xf0] }
 0x2bc   : > { %v3818_v18 = vor.u32 %v4070_v13, %v3817_v59  ;;  %v3570_v58 = vor.u32 %v4004_v50, %v3567_v51  ;;  %v4032_v59 = vld [vmem:[%s6078_s10 + $0x244] sm:$0xf]  ;;  %v3969_v50 = vld [vmem:[%s6078_s10 + $0x4c] sm:$0xf]  ;;  %v3427_v51 = vld [vmem:[%s6078_s10 + $0x64] sm:$0xf0] }
 0x2be   : > { %2362 = vmatpush.bf16.msra.mxu2 %v3726_v48  ;;  %2390 = vmatpush.bf16.msrb.mxu0 %v3730_v37  ;;  %v1518_v48 = vperm.slane %v1515_v53, 1  ;;  %v3993_v53 = vld [vmem:[%s6078_s10 + $0x108] sm:$0xf0] }
 0x2bf   : > { %2376 = vmatpush.bf16.msrb.mxu3 %v3506_v25  ;;  %2351 = vmatpush.bf16.msrb.mxu1 %v3418_v0  ;;  %v3791_v25 = vld [vmem:[%s6078_s10 + $0x33c] sm:$0xf0]  ;;  %v3539_v0 = vld [vmem:[%s6078_s10 + $0x144] sm:$0xf0] }
 0x2c0   : > { %v3794_v36 = vor.u32 %v4060_v24, %v3791_v25  ;;  %v3542_v9 = vor.u32 %v3997_v62, %v3539_v0  ;;  %v4025_v24 = vld [vmem:[%s6078_s10 + $0x20c] sm:$0xf]  ;;  %v3651_v25 = vld [vmem:[%s6078_s10 + $0x224] sm:$0xf0]  ;;  %v3399_v62 = vld [vmem:[%s6078_s10 + $0x2c] sm:$0xf0] }
 0x2c1   : > { %v3601_v0 = vld [vmem:[%s6078_s10 + $0x1a0] sm:$0xf] }
 0x2c2   : > { %2363 = vmatpush.bf16.msra.mxu2 %v3698_v16  ;;  %2391 = vmatpush.bf16.msrb.mxu0 %v3702_v19  ;;  %v3822_v19 = vor.u32 %v4067_v14, %v3819_v15  ;;  %v3481_v15 = vld [vmem:[%s6078_s10 + $0xb8] sm:$0xf] }
 0x2c3   : > { %2377 = vmatpush.bf16.msrb.mxu3 %v3478_v42  ;;  %2352 = vmatpush.bf16.msrb.mxu1 %v3390_v7  ;;  %v3707_v7 = vld [vmem:[%s6078_s10 + $0x294] sm:$0xf0] }
 0x2c6   : > { %2364 = vmatpush.bf16.msra.mxu2 %v3670_v28  ;;  %2392 = vmatpush.bf16.msrb.mxu0 %v3674_v33  ;;  %v3595_v33 = vld [vmem:[%s6078_s10 + $0x1b4] sm:$0xf0] }
 0x2c7   : > { %2378 = vmatpush.bf16.msrb.mxu3 %v3450_v55  ;;  %v3598_v40 = vor.u32 %v4011_v32, %v3595_v33  ;;  %v3733_v55 = vld [vmem:[%s6078_s10 + $0x2b0] sm:$0xf]  ;;  %v3976_v32 = vld [vmem:[%s6078_s10 + $0x84] sm:$0xf]  ;;  %v3455_v33 = vld [vmem:[%s6078_s10 + $0x9c] sm:$0xf0] }
 0x2c8   : > { %v3734_v1 = vor.u32 %v4049_v56, %v3733_v55  ;;  %v3458_v45 = vor.u32 %v3976_v32, %v3455_v33  ;;  %v3426_v56 = vor.u32 %v3972_v49, %v3425_v46  ;;  %v3629_v32 = vld [vmem:[%s6078_s10 + $0x1d8] sm:$0xf]  ;;  %v4022_v33 = vld [vmem:[%s6078_s10 + $0x1f0] sm:$0xf0] }
 0x2ca   : > { %2365 = vmatpush.bf16.msra.mxu2 %v3642_v35  ;;  %2393 = vmatpush.bf16.msrb.mxu0 %v3646_v47  ;;  %v3594_v35 = vor.u32 %v4014_v30, %v3593_v27  ;;  %v3979_v30 = vld [vmem:[%s6078_s10 + $0x98] sm:$0xf0] }
 0x2cb   : > { %2379 = vmatpush.bf16.msrb.mxu3 %v3422_v3  ;;  %v3705_v3 = vld [vmem:[%s6078_s10 + $0x278] sm:$0xf] }
 0x2ce   : > { %2366 = vmatpush.bf16.msra.mxu2 %v3614_v29  ;;  %2394 = vmatpush.bf16.msrb.mxu0 %v3618_v60  ;;  %v3735_v29 = vld [vmem:[%s6078_s10 + $0x2cc] sm:$0xf0]  ;;  %v3537_v60 = vld [vmem:[%s6078_s10 + $0x128] sm:$0xf] }
 0x2cf   : > { %2380 = vmatpush.bf16.msrb.mxu3 %v3394_v4  ;;  %v3738_v2 = vor.u32 %v4046_v57, %v3735_v29  ;;  %v3538_v8 = vor.u32 %v4000_v61, %v3537_v60  ;;  %v3509_v4 = vld [vmem:[%s6078_s10 + $0xf0] sm:$0xf]  ;;  %v3430_v57 = vor.u32 %v3969_v50, %v3427_v51  ;;  %v3797_v29 = vld [vmem:[%s6078_s10 + $0x328] sm:$0xf]  ;;  %v3965_v60 = vld [vmem:[%s6078_s10 + $0x28] sm:$0xf0] }
 0x2d0   : > { %v3510_v13 = vor.u32 %v3993_v53, %v3509_v4  ;;  %v3962_v61 = vld [vmem:[%s6078_s10 + $0x14] sm:$0xf]  ;;  %v4008_v4 = vld [vmem:[%s6078_s10 + $0x180] sm:$0xf0] }
 0x32e   : > { %v1558_v63 = vpop.f32.mrf.mxu0 }
 0x32f   : > { %v1559_v44 = vadd.f32 %v1558_v63, %v1518_v48  ;;  %v3990_v63 = vld [vmem:[%s6078_s10 + $0xf4] sm:$0xf] }
 0x331   : > { %v1564_v16 = vmax.f32 %v1559_v44, 0.0  ;;  %v3710_v44 = vor.u32 %v4039_v6, %v3707_v7  ;;  %v3769_v6 = vld [vmem:[%s6078_s10 + $0x2f0] sm:$0xf]  ;;  %v4057_v7 = vld [vmem:[%s6078_s10 + $0x308] sm:$0xf0] }
 0x332   : > { %v3770_v53 = vor.u32 %v4057_v7, %v3769_v6 }
 0x334   : > { %v1544_v37 = vpop.f32.mrf.mxu2 }
 0x335   : > { %v1545_v21 = vadd.f32 %v1544_v37, %v1517_v10  ;;  %v3706_v37 = vor.u32 %v4042_v5, %v3705_v3  ;;  %v3402_v5 = vor.u32 %v3962_v61, %v3399_v62 }
 0x336   : > { %v1560_v11 = vpop.f32.mrf.mxu0 }
 0x337   : > { %v1561_v12 = vadd.f32 %v1560_v11, %v1518_v48  ;;  %v1563_v41 = vmax.f32 %v1545_v21, 0.0  ;;  %v3511_v48 = vld [vmem:[%s6078_s10 + $0x10c] sm:$0xf0]  ;;  %v4035_v11 = vld [vmem:[%s6078_s10 + $0x258] sm:$0xf0] }
 0x338   : > { %v3514_v14 = vor.u32 %v3990_v63, %v3511_v48  ;;  %v3649_v21 = vld [vmem:[%s6078_s10 + $0x208] sm:$0xf]  ;;  %v3741_v63 = vld [vmem:[%s6078_s10 + $0x2b8] sm:$0xf]  ;;  %v4050_v48 = vld [vmem:[%s6078_s10 + $0x2d0] sm:$0xf0] }
 0x339   : > { %v1566_v17 = vmax.f32 %v1561_v12, 0.0  ;;  %v3679_v12 = vld [vmem:[%s6078_s10 + $0x25c] sm:$0xf0] }
 0x33a   : > { %v3682_v20 = vor.u32 %v4032_v59, %v3679_v12  ;;  %v3713_v59 = vld [vmem:[%s6078_s10 + $0x280] sm:$0xf]  ;;  %v4043_v12 = vld [vmem:[%s6078_s10 + $0x298] sm:$0xf0] }
 0x33b   : > { %v5523_v22 = vpack.c.bf16 %v1566_v17, %v1564_v16  ;;  %v3986_v16 = vld [vmem:[%s6078_s10 + $0xd0] sm:$0xf0]  ;;  %v3983_v17 = vld [vmem:[%s6078_s10 + $0xbc] sm:$0xf] }
 0x33c   : > { %v1546_v26 = vpop.f32.mrf.mxu2 }
 0x33d   : > { %v1547_v28 = vadd.f32 %v1546_v26, %v1517_v10  ;;  %2311 = vmatmul.bf16.vlgmr.msrb.gmra.mxu2 %v5523_v22  ;;  %2339 = vmatmul.bf16.vlgmr.msra.gmra.mxu0 %v5523_v22  ;;  %v3677_v10 = vld [vmem:[%s6078_s10 + $0x240] sm:$0xf]  ;;  %v3482_v26 = vor.u32 %v3986_v16, %v3481_v15  ;;  %v3994_v15 = vld [vmem:[%s6078_s10 + $0x110] sm:$0xf0]  ;;  %v3714_v16 = vor.u32 %v4043_v12, %v3713_v59 }
 0x33e   : > { %2415 = vmatpush.bf16.msrb.mxu2 %v3818_v18  ;;  %2443 = vmatpush.bf16.msra.mxu0 %v3822_v19  ;;  %v3483_v18 = vld [vmem:[%s6078_s10 + $0xd4] sm:$0xf0]  ;;  %v3678_v19 = vor.u32 %v4035_v11, %v3677_v10  ;;  %v4001_v10 = vld [vmem:[%s6078_s10 + $0x148] sm:$0xf0]  ;;  %v3742_v11 = vor.u32 %v4050_v48, %v3741_v63 }
 0x33f   : > { %v1565_v42 = vmax.f32 %v1547_v28, 0.0  ;;  %v3486_v27 = vor.u32 %v3983_v17, %v3483_v18  ;;  %v3453_v28 = vld [vmem:[%s6078_s10 + $0x80] sm:$0xf]  ;;  %v3685_v17 = vld [vmem:[%s6078_s10 + $0x248] sm:$0xf] }
 0x340   : > { %v3454_v43 = vor.u32 %v3979_v30, %v3453_v28  ;;  %v4036_v18 = vld [vmem:[%s6078_s10 + $0x260] sm:$0xf0] }
 0x341   : > { %v5563_v47 = vpack.c.bf16 %v1565_v42, %v1563_v41  ;;  %v4018_v41 = vld [vmem:[%s6078_s10 + $0x1d4] sm:$0xf]  ;;  %v3623_v42 = vld [vmem:[%s6078_s10 + $0x1ec] sm:$0xf0]  ;;  %v3980_v28 = vld [vmem:[%s6078_s10 + $0xa0] sm:$0xf0] }
 0x342   : > { %2416 = vmatpush.bf16.msrb.mxu2 %v3790_v34  ;;  %2444 = vmatpush.bf16.msra.mxu0 %v3794_v36  ;;  %v3650_v34 = vor.u32 %v4028_v23, %v3649_v21  ;;  %v3654_v36 = vor.u32 %v4025_v24, %v3651_v25  ;;  %v3987_v21 = vld [vmem:[%s6078_s10 + $0xd8] sm:$0xf0]  ;;  %v3686_v23 = vor.u32 %v4036_v18, %v3685_v17  ;;  %v3657_v24 = vld [vmem:[%s6078_s10 + $0x210] sm:$0xf]  ;;  %v4029_v25 = vld [vmem:[%s6078_s10 + $0x228] sm:$0xf0] }
 0x343   : > { %2297 = vmatmul.bf16.vlgmr.msra.gmra.mxu1 %v5563_v47  ;;  %2325 = vmatmul.bf16.vlgmr.msra.gmra.mxu3 %v5563_v47  ;;  %v3658_v30 = vor.u32 %v4029_v25, %v3657_v24 }
 0x344   : > { %2401 = vmatpush.bf16.msra.mxu1 %v3594_v35  ;;  %2429 = vmatpush.bf16.msra.mxu3 %v3598_v40  ;;  %v3825_v35 = vld [vmem:[%s6078_s10 + $0x360] sm:$0xf]  ;;  %v4071_v40 = vld [vmem:[%s6078_s10 + $0x378] sm:$0xf0] }
 0x345   : > { %v3826_v55 = vor.u32 %v4071_v40, %v3825_v35  ;;  %v5817_v35 = vld [vmem:[%s6079_s11] sm:$0x7f] }
 0x346   : > { %2417 = vmatpush.bf16.msrb.mxu2 %v3762_v52  ;;  %2445 = vmatpush.bf16.msra.mxu0 %v3766_v54  ;;  %v3622_v52 = vor.u32 %v4021_v39, %v3621_v38  ;;  %v3626_v54 = vor.u32 %v4018_v41, %v3623_v42  ;;  %v3973_v38 = vld [vmem:[%s6078_s10 + $0x68] sm:$0xf0]  ;;  %v3630_v39 = vor.u32 %v4022_v33, %v3629_v32  ;;  %v3405_v42 = vld [vmem:[%s6078_s10 + $0x18] sm:$0xf]  ;;  %v1699_v40 = vperm.slane %v5817_v35, 0 }
 0x348   : > { %2402 = vmatpush.bf16.msra.mxu1 %v3566_v31  ;;  %2430 = vmatpush.bf16.msra.mxu3 %v3570_v58  ;;  %v4064_v31 = vld [vmem:[%s6078_s10 + $0x340] sm:$0xf0]  ;;  %v3397_v58 = vld [vmem:[%s6078_s10 + $0x10] sm:$0xf] }
 0x349   : > { %v3398_v3 = vor.u32 %v3965_v60, %v3397_v58 }
 0x34a   : > { %2418 = vmatpush.bf16.msrb.mxu2 %v3734_v1  ;;  %2446 = vmatpush.bf16.msra.mxu0 %v3738_v2  ;;  %v4015_v1 = vld [vmem:[%s6078_s10 + $0x1b8] sm:$0xf0]  ;;  %v3798_v2 = vor.u32 %v4064_v31, %v3797_v29 }
 0x34c   : > { %2403 = vmatpush.bf16.msra.mxu1 %v3538_v8  ;;  %2431 = vmatpush.bf16.msra.mxu3 %v3542_v9  ;;  %v3602_v8 = vor.u32 %v4015_v1, %v3601_v0  ;;  %v3573_v9 = vld [vmem:[%s6078_s10 + $0x168] sm:$0xf]  ;;  %v1701_v1 = vperm.slane %v5817_v35, 2 }
 0x34d   : > { %2367 = vmatmul.bf16.vlgmr.msra.gmra.mxu2 %v5523_v22  ;;  %2395 = vmatmul.bf16.vlgmr.msrb.gmra.mxu0 %v5523_v22 }
 0x34e   : > { %2419 = vmatpush.bf16.msrb.mxu2 %v3706_v37  ;;  %2447 = vmatpush.bf16.msra.mxu0 %v3710_v44  ;;  %v3574_v37 = vor.u32 %v4008_v4, %v3573_v9  ;;  %v3545_v44 = vld [vmem:[%s6078_s10 + $0x130] sm:$0xf] }
 0x350   : > { %2404 = vmatpush.bf16.msra.mxu1 %v3510_v13  ;;  %2432 = vmatpush.bf16.msra.mxu3 %v3514_v14  ;;  %v3546_v13 = vor.u32 %v4001_v10, %v3545_v44  ;;  %v3517_v14 = vld [vmem:[%s6078_s10 + $0xf8] sm:$0xf] }
 0x352   : > { %2420 = vmatpush.bf16.msrb.mxu2 %v3678_v19  ;;  %2448 = vmatpush.bf16.msra.mxu0 %v3682_v20  ;;  %v3518_v19 = vor.u32 %v3994_v15, %v3517_v14  ;;  %v3489_v20 = vld [vmem:[%s6078_s10 + $0xc0] sm:$0xf] }
 0x353   : > { %2353 = vmatmul.bf16.vlgmr.msrb.gmra.mxu1 %v5563_v47  ;;  %2381 = vmatmul.bf16.vlgmr.msrb.gmra.mxu3 %v5563_v47 }
 0x354   : > { %2405 = vmatpush.bf16.msra.mxu1 %v3482_v26  ;;  %2433 = vmatpush.bf16.msra.mxu3 %v3486_v27  ;;  %v3490_v26 = vor.u32 %v3987_v21, %v3489_v20  ;;  %v3461_v27 = vld [vmem:[%s6078_s10 + $0x88] sm:$0xf] }
 0x356   : > { %2421 = vmatpush.bf16.msrb.mxu2 %v3650_v34  ;;  %2449 = vmatpush.bf16.msra.mxu0 %v3654_v36  ;;  %v3462_v34 = vor.u32 %v3980_v28, %v3461_v27  ;;  %v3433_v36 = vld [vmem:[%s6078_s10 + $0x50] sm:$0xf] }
 0x357   : > { %v3434_v41 = vor.u32 %v3973_v38, %v3433_v36  ;;  %v1704_v36 = vperm.slane %v5817_v35, 5 }
 0x358   : > { %2406 = vmatpush.bf16.msra.mxu1 %v3454_v43  ;;  %2434 = vmatpush.bf16.msra.mxu3 %v3458_v45  ;;  %v3966_v43 = vld [vmem:[%s6078_s10 + $0x30] sm:$0xf0] }
 0x359   : > { %v3406_v45 = vor.u32 %v3966_v43, %v3405_v42 }
 0x35a   : > { %2422 = vmatpush.bf16.msrb.mxu2 %v3622_v52  ;;  %2450 = vmatpush.bf16.msra.mxu0 %v3626_v54  ;;  %v1700_v54 = vperm.slane %v5817_v35, 1 }
 0x35c   : > { %2407 = vmatpush.bf16.msra.mxu1 %v3426_v56  ;;  %2435 = vmatpush.bf16.msra.mxu3 %v3430_v57 }
 0x35d   : > { %2423 = vmatmul.bf16.vlgmr.msrb.gmra.mxu2 %v5523_v22  ;;  %2451 = vmatmul.bf16.vlgmr.msra.gmra.mxu0 %v5523_v22 }
 0x35e   : > { %2471 = vmatpush.bf16.msra.mxu2 %v3826_v55 }
 0x360   : > { %2408 = vmatpush.bf16.msra.mxu1 %v3398_v3  ;;  %2436 = vmatpush.bf16.msra.mxu3 %v3402_v5 }
 0x362   : > { %2472 = vmatpush.bf16.msra.mxu2 %v3798_v2 }
 0x363   : > { %2409 = vmatmul.bf16.vlgmr.msra.gmra.mxu1 %v5563_v47  ;;  %2437 = vmatmul.bf16.vlgmr.msra.gmra.mxu3 %v5563_v47 }
 0x364   : > { %2457 = vmatpush.bf16.msrb.mxu1 %v3602_v8 }
 0x366   : > { %2473 = vmatpush.bf16.msra.mxu2 %v3770_v53 }
 0x368   : > { %2458 = vmatpush.bf16.msrb.mxu1 %v3574_v37  ;;  %v1702_v37 = vperm.slane %v5817_v35, 3 }
 0x36a   : > { %2474 = vmatpush.bf16.msra.mxu2 %v3742_v11 }
 0x36c   : > { %2459 = vmatpush.bf16.msrb.mxu1 %v3546_v13 }
 0x36e   : > { %2475 = vmatpush.bf16.msra.mxu2 %v3714_v16 }
 0x370   : > { %2460 = vmatpush.bf16.msrb.mxu1 %v3518_v19 }
 0x372   : > { %2476 = vmatpush.bf16.msra.mxu2 %v3686_v23 }
 0x374   : > { %2461 = vmatpush.bf16.msrb.mxu1 %v3490_v26 }
 0x376   : > { %2477 = vmatpush.bf16.msra.mxu2 %v3658_v30 }
 0x378   : > { %2462 = vmatpush.bf16.msrb.mxu1 %v3462_v34  ;;  %v1703_v34 = vperm.slane %v5817_v35, 4 }
 0x37a   : > { %2478 = vmatpush.bf16.msra.mxu2 %v3630_v39 }
 0x37c   : > { %2463 = vmatpush.bf16.msrb.mxu1 %v3434_v41 }
 0x37d   : > { %2479 = vmatmul.bf16.vlgmr.msra.gmra.mxu2 %v5523_v22 }
 0x380   : > { %2464 = vmatpush.bf16.msrb.mxu1 %v3406_v45 }
 0x383   : > { %2465 = vmatmul.bf16.vlgmr.msrb.gmra.mxu1 %v5563_v47 }
 0x3ba   : > { %v2340_v51 = vpop.f32.mrf.mxu0 }
 0x3c0   : > { %v2298_v46 = vpop.f32.mrf.mxu1  ;;  %v2312_v49 = vpop.f32.mrf.mxu2 }
 0x3c1   : > { %v2299_v50 = vadd.f32 %v2298_v46, %v1699_v40 }
 0x3c2   : > { %v2342_v61 = vpop.f32.mrf.mxu0 }
 0x3c3   : > { %v2313_v52 = vadd.f32 %v2312_v49, %v2299_v50 }
 0x3c5   : > { %v3827_v55 = vmul.f32 -1.442695, %v2313_v52 }
 0x3c6   : > { %v2326_v56 = vpop.f32.mrf.mxu3 }
 0x3c7   : > { %4124 = vpow2.f32 %v3827_v55  ;;  %v2327_v22 = vadd.f32 %v2326_v56, %v1700_v54 }
 0x3c8   : > { %v2300_v57 = vpop.f32.mrf.mxu1  ;;  %v2314_v47 = vpop.f32.mrf.mxu2 }
 0x3c9   : > { %v2341_v29 = vadd.f32 %v2340_v51, %v2327_v22  ;;  %v2301_v31 = vadd.f32 %v2300_v57, %v1699_v40 }
 0x3ca   : > { %v2396_v59 = vpop.f32.mrf.mxu0 }
 0x3cb   : > { %v3828_v58 = vmul.f32 -1.442695, %v2341_v29  ;;  %v2315_v60 = vadd.f32 %v2314_v47, %v2301_v31 }
 0x3cd   : > { %v4125_v62 = vpop.eup %4124  ;;  %4126 = vpow2.f32 %v3828_v58  ;;  %v3834_v0 = vmul.f32 -1.442695, %v2315_v60 }
 0x3ce   : > { %v2527_v2 = vadd.f32 1.0, %v4125_v62  ;;  %v2328_v3 = vpop.f32.mrf.mxu3 }
 0x3cf   : > { %4128 = vpow2.f32 %v3834_v0  ;;  %v2329_v5 = vadd.f32 %v2328_v3, %v1700_v54 }
 0x3d0   : > { %4130 = vrcp.f32 %v2527_v2  ;;  %v2354_v6 = vpop.f32.mrf.mxu1  ;;  %v2368_v9 = vpop.f32.mrf.mxu2  ;;  %v2550_v25 = vand.u32 2147483647, %v2527_v2  ;;  %v2552_v26 = vand.u32 2147483648, %v2527_v2  ;;  %vm2546_vm5 = vweird.f32 %v2527_v2 }
 0x3d1   : > { %v2343_v7 = vadd.f32 %v2342_v61, %v2329_v5  ;;  %v2355_v8 = vadd.f32 %v2354_v6, %v1701_v1 }
 0x3d2   : > { %vm5848_vm6 = vcmp.eq.f32.partialorder %v2550_v25, 8.507059e+37  ;;  %v2553_v49 = vor.u32 1.1754944e-38, %v2552_v26  ;;  %v2398_v51 = vpop.f32.mrf.mxu0 }
 0x3d3   : > { %v4127_v4 = vpop.eup %4126  ;;  %v3835_v53 = vmul.f32 -1.442695, %v2343_v7  ;;  %v2369_v63 = vadd.f32 %v2368_v9, %v2355_v8 }
 0x3d4   : > { %v5822_v48 = vadd.f32 1.0, %v4127_v4 }
 0x3d5   : > { %v4129_v44 = vpop.eup %4128  ;;  %4132 = vpow2.f32 %v3835_v53  ;;  %v3829_v10 = vmul.f32 -1.442695, %v2369_v63 }
 0x3d6   : > { %v5825_v11 = vpop.eup %4130  ;;  %4134 = vrcp.f32 %v5822_v48  ;;  %v2382_v12 = vpop.f32.mrf.mxu3  ;;  %v5829_v14 = vadd.f32 1.0, %v4129_v44  ;;  %v2565_v33 = vand.u32 2147483647, %v5822_v48  ;;  %v2567_v45 = vand.u32 2147483648, %v5822_v48 }
 0x3d7   : > { %v2542_v13 = vmul.f32 %v5825_v11, %v2527_v2  ;;  %4136 = vpow2.f32 %v3829_v10  ;;  %v2383_v15 = vadd.f32 %v2382_v12, %v1702_v37  ;;  %vm2547_vm4 = vweird.f32 %v5825_v11 }
 0x3d8   : > { %v2356_v16 = vpop.f32.mrf.mxu1  ;;  %4138 = vrcp.f32 %v5829_v14  ;;  %v2370_v23 = vpop.f32.mrf.mxu2  ;;  %vm5856_vm7 = vmor %vm2546_vm5, %vm2547_vm4  ;;  %vm2561_vm8 = vweird.f32 %v5822_v48  ;;  %vm5869_vm10 = vcmp.eq.f32.partialorder %v2565_v33, 8.507059e+37  ;;  %v2568_v31 = vor.u32 1.1754944e-38, %v2567_v45 }
 0x3d9   : > { %v2543_v17 = vsub.f32 1.0, %v2542_v13  ;;  %v2397_v18 = vadd.f32 %v2396_v59, %v2383_v15  ;;  %v2357_v19 = vadd.f32 %v2356_v16, %v1701_v1  ;;  %vm2651_vm12 = vweird.f32 %v5829_v14 }
 0x3da   : > { %v2655_v0 = vand.u32 2147483647, %v5829_v14  ;;  %v1705_v13 = vperm.slane %v5817_v35, 6 }
 0x3db   : > { %v4133_v20 = vpop.eup %4132  ;;  %v2544_v21 = vmul.f32 %v5825_v11, %v2543_v17  ;;  %v3830_v28 = vmul.f32 -1.442695, %v2397_v18  ;;  %v2371_v39 = vadd.f32 %v2370_v23, %v2357_v19 }
 0x3dc   : > { %v4135_v24 = vpop.eup %4134  ;;  %v5833_v27 = vadd.f32 1.0, %v4133_v20  ;;  %vm5898_vm14 = vcmp.eq.f32.partialorder %v2655_v0, 8.507059e+37 }
 0x3dd   : > { %v4137_v30 = vpop.eup %4136  ;;  %v2557_v32 = vmul.f32 %v4135_v24, %v5822_v48  ;;  %v2545_v38 = vadd.f32 %v5825_v11, %v2544_v21  ;;  %vm2562_vm9 = vweird.f32 %v4135_v24  ;;  %v3836_v47 = vmul.f32 -1.442695, %v2371_v39  ;;  %v2452_v21 = vpop.f32.mrf.mxu0 }
 0x3de   : > { %4140 = vrcp.f32 %v5833_v27  ;;  %v2384_v41 = vpop.f32.mrf.mxu3  ;;  %v5842_v42 = vpop.eup %4138  ;;  %v5846_v40 = vadd.f32 1.0, %v4137_v30  ;;  %vm2563_vm11 = vmor %vm2561_vm8, %vm2562_vm9  ;;  %v2672_v59 = vand.u32 2147483648, %v5833_v27  ;;  %v2670_v16 = vand.u32 2147483647, %v5833_v27 }
 0x3df   : > { %v2558_v43 = vsub.f32 1.0, %v2557_v32  ;;  %4142 = vpow2.f32 %v3830_v28  ;;  %v2647_v50 = vmul.f32 %v5842_v42, %v5829_v14  ;;  %v2549_v56 = vsel %vm5856_vm7, %v5825_v11, %v2545_v38 }
 0x3e0   : > { %v2410_v52 = vpop.f32.mrf.mxu1  ;;  %4144 = vrcp.f32 %v5846_v40  ;;  %v2385_v58 = vadd.f32 %v2384_v41, %v1702_v37  ;;  %v2554_v2 = vsel %vm5848_vm6, %v2553_v49, %v2549_v56  ;;  %v2424_v7 = vpop.f32.mrf.mxu2  ;;  %vm2652_vm13 = vweird.f32 %v5842_v42 }
 0x3e1   : > { %v2559_v55 = vmul.f32 %v4135_v24, %v2558_v43  ;;  %v2648_v57 = vsub.f32 1.0, %v2647_v50  ;;  %v2411_v60 = vadd.f32 %v2410_v52, %v1703_v34  ;;  %4146 = vpow2.f32 %v3836_v47  ;;  %vm5907_vm0 = vmor %vm2651_vm12, %vm2652_vm13 }
 0x3e2   : > { %v2399_v6 = vadd.f32 %v2398_v51, %v2385_v58  ;;  %v2657_v11 = vand.u32 2147483648, %v5829_v14  ;;  %vm2666_vm1 = vweird.f32 %v5833_v27  ;;  %v2673_v30 = vor.u32 1.1754944e-38, %v2672_v59 }
 0x3e3   : > { %v2560_v29 = vadd.f32 %v4135_v24, %v2559_v55  ;;  %v2649_v62 = vmul.f32 %v5842_v42, %v2648_v57  ;;  %v2425_v4 = vadd.f32 %v2424_v7, %v2411_v60  ;;  %vm2671_vm3 = vcmp.eq.f32.partialorder %v2670_v16, 8.507059e+37 }
 0x3e4   : > { %v4141_v61 = vpop.eup %4140  ;;  %v3837_v44 = vmul.f32 -1.442695, %v2399_v6  ;;  %v2658_v28 = vor.u32 1.1754944e-38, %v2657_v11  ;;  %vm2576_vm4 = vweird.f32 %v5846_v40  ;;  %v2580_v50 = vand.u32 2147483647, %v5846_v40 }
 0x3e5   : > { %v4143_v1 = vpop.eup %4142  ;;  %v2564_v3 = vsel %vm2563_vm11, %v4135_v24, %v2560_v29  ;;  %v2662_v5 = vmul.f32 %v4141_v61, %v5833_v27  ;;  %v2650_v48 = vadd.f32 %v5842_v42, %v2649_v62  ;;  %vm2667_vm15 = vweird.f32 %v4141_v61 }
 0x3e6   : > { %v2569_v8 = vsel %vm5869_vm10, %v2568_v31, %v2564_v3  ;;  %v5884_v9 = vadd.f32 1.0, %v4143_v1  ;;  %v5886_v53 = vpop.eup %4144  ;;  %v2438_v10 = vpop.f32.mrf.mxu3  ;;  %v3831_v23 = vmul.f32 -1.442695, %v2425_v4  ;;  %vm2668_vm2 = vmor %vm2666_vm1, %vm2667_vm15  ;;  %v2582_v47 = vand.u32 2147483648, %v5846_v40 }
 0x3e7   : > { %v2751_v63 = vpack.c.bf16 %v2569_v8, %v2554_v2  ;;  %v2663_v37 = vsub.f32 1.0, %v2662_v5  ;;  %v2572_v12 = vmul.f32 %v5886_v53, %v5846_v40  ;;  %v4147_v18 = vpop.eup %4146  ;;  %v2654_v24 = vsel %vm5907_vm0, %v5842_v42, %v2650_v48  ;;  %v2454_v1 = vpop.f32.mrf.mxu0 }
 0x3e8   : > { %4148 = vrcp.f32 %v5884_v9  ;;  %v2412_v17 = vpop.f32.mrf.mxu1  ;;  %v5915_v26 = vadd.f32 1.0, %v4147_v18  ;;  %v2439_v14 = vadd.f32 %v2438_v10, %v1704_v36  ;;  %v2659_v39 = vsel %vm5898_vm14, %v2658_v28, %v2654_v24  ;;  %v2426_v46 = vpop.f32.mrf.mxu2 }
 0x3e9   : > { %2759 = vst [vmem:[%s5895_s20] sm:$0xff] %v2751_v63  ;;  %v2664_v15 = vmul.f32 %v4141_v61, %v2663_v37  ;;  %v2573_v20 = vsub.f32 1.0, %v2572_v12  ;;  %4150 = vpow2.f32 %v3837_v44  ;;  %v2413_v27 = vadd.f32 %v2412_v17, %v1703_v34 }
 0x3ea   : > { %4152 = vpow2.f32 %v3831_v23  ;;  %v2453_v42 = vadd.f32 %v2452_v21, %v2439_v14  ;;  %vm2577_vm5 = vweird.f32 %v5886_v53  ;;  %v2597_v29 = vand.u32 2147483648, %v5884_v9 }
 0x3eb   : > { %v2665_v25 = vadd.f32 %v4141_v61, %v2664_v15  ;;  %v2574_v33 = vmul.f32 %v5886_v53, %v2573_v20  ;;  %4154 = vrcp.f32 %v5915_v26  ;;  %v2427_v52 = vadd.f32 %v2426_v46, %v2413_v27  ;;  %vm5946_vm7 = vmor %vm2576_vm4, %vm2577_vm5 }
 0x3ec   : > { %v3832_v51 = vmul.f32 -1.442695, %v2453_v42  ;;  %vm2591_vm8 = vweird.f32 %v5884_v9  ;;  %v2583_v40 = vor.u32 1.1754944e-38, %v2582_v47  ;;  %v2598_v6 = vor.u32 1.1754944e-38, %v2597_v29 }
 0x3ed   : > { %v2669_v32 = vsel %vm2668_vm2, %v4141_v61, %v2665_v25  ;;  %v2575_v54 = vadd.f32 %v5886_v53, %v2574_v33  ;;  %v3838_v31 = vmul.f32 -1.442695, %v2427_v52  ;;  %v2595_v61 = vand.u32 2147483647, %v5884_v9 }
 0x3ee   : > { %v4149_v38 = vpop.eup %4148  ;;  %v2674_v41 = vsel %vm2671_vm3, %v2673_v30, %v2669_v32  ;;  %v2440_v34 = vpop.f32.mrf.mxu3  ;;  %4156 = vpow2.f32 %v3832_v51  ;;  %vm2581_vm10 = vcmp.eq.f32.partialorder %v2580_v50, 8.507059e+37  ;;  %v2685_v12 = vand.u32 2147483647, %v5915_v26 }
 0x3ef   : > { %v2755_v43 = vpack.c.bf16 %v2674_v41, %v2659_v39  ;;  %v2587_v45 = vmul.f32 %v4149_v38, %v5884_v9  ;;  %v4151_v49 = vpop.eup %4150  ;;  %v2441_v22 = vadd.f32 %v2440_v34, %v1704_v36  ;;  %vm2592_vm6 = vweird.f32 %v4149_v38 }
 0x3f0   : > { %v5932_v56 = vadd.f32 1.0, %v4151_v49  ;;  %v4153_v57 = vpop.eup %4152  ;;  %v2579_v2 = vsel %vm5946_vm7, %v5886_v53, %v2575_v54  ;;  %vm2593_vm9 = vmor %vm2591_vm8, %vm2592_vm6  ;;  %vm2596_vm11 = vcmp.eq.f32.partialorder %v2595_v61, 8.507059e+37  ;;  %vm2681_vm13 = vweird.f32 %v5915_v26 }
 0x3f1   : > { %2764 = vst [vmem:[%s5895_s20 + $0x1c] sm:$0xff] %v2755_v43  ;;  %v2588_v55 = vsub.f32 1.0, %v2587_v45  ;;  %v5938_v58 = vpop.eup %4154  ;;  %v5953_v0 = vadd.f32 1.0, %v4153_v57  ;;  %v2455_v5 = vadd.f32 %v2454_v1, %v2441_v22  ;;  %v2584_v63 = vsel %vm2581_vm10, %v2583_v40, %v2579_v2 }
 0x3f2   : > { %4158 = vrcp.f32 %v5932_v56  ;;  %v2677_v62 = vmul.f32 %v5938_v58, %v5915_v26  ;;  %vm2682_vm12 = vweird.f32 %v5938_v58  ;;  %v2687_v19 = vand.u32 2147483648, %v5915_v26 }
 0x3f3   : > { %v2589_v60 = vmul.f32 %v4149_v38, %v2588_v55  ;;  %4160 = vpow2.f32 %v3838_v31  ;;  %v3839_v9 = vmul.f32 -1.442695, %v2455_v5  ;;  %v2702_v20 = vand.u32 2147483648, %v5932_v56  ;;  %vm5980_vm15 = vmor %vm2681_vm13, %vm2682_vm12 }
 0x3f4   : > { %v2678_v7 = vsub.f32 1.0, %v2677_v62  ;;  %4162 = vrcp.f32 %v5953_v0  ;;  %v4157_v4 = vpop.eup %4156  ;;  %v2700_v24 = vand.u32 2147483647, %v5932_v56  ;;  %vm2686_vm0 = vcmp.eq.f32.partialorder %v2685_v12, 8.507059e+37 }
 0x3f5   : > { %v2590_v3 = vadd.f32 %v4149_v38, %v2589_v60  ;;  %v5960_v10 = vadd.f32 1.0, %v4157_v4  ;;  %4164 = vpow2.f32 %v3839_v9  ;;  %vm2696_vm1 = vweird.f32 %v5932_v56 }
 0x3f6   : > { %v2679_v37 = vmul.f32 %v5938_v58, %v2678_v7  ;;  %v2703_v39 = vor.u32 1.1754944e-38, %v2702_v20  ;;  %vm2701_vm3 = vcmp.eq.f32.partialorder %v2700_v24, 8.507059e+37  ;;  %vm2606_vm4 = vweird.f32 %v5953_v0 }
 0x3f7   : > { %v2594_v8 = vsel %vm2593_vm9, %v4149_v38, %v2590_v3  ;;  %4166 = vrcp.f32 %v5960_v10  ;;  %v2688_v38 = vor.u32 1.1754944e-38, %v2687_v19  ;;  %v2612_v55 = vand.u32 2147483648, %v5953_v0 }
 0x3f8   : > { %v2599_v48 = vsel %vm2596_vm11, %v2598_v6, %v2594_v8  ;;  %v4159_v53 = vpop.eup %4158  ;;  %v2680_v16 = vadd.f32 %v5938_v58, %v2679_v37  ;;  %v2610_v29 = vand.u32 2147483647, %v5953_v0  ;;  %vm2621_vm8 = vweird.f32 %v5960_v10 }
 0x3f9   : > { %v2752_v44 = vpack.c.bf16 %v2599_v48, %v2584_v63  ;;  %v2692_v11 = vmul.f32 %v4159_v53, %v5932_v56  ;;  %v4161_v59 = vpop.eup %4160  ;;  %vm2697_vm14 = vweird.f32 %v4159_v53  ;;  %v2627_v56 = vand.u32 2147483648, %v5960_v10 }
 0x3fa   : > { %v5967_v15 = vpop.eup %4162  ;;  %v5971_v18 = vadd.f32 1.0, %v4161_v59  ;;  %v2684_v27 = vsel %vm5980_vm15, %v5938_v58, %v2680_v16  ;;  %vm2698_vm2 = vmor %vm2696_vm1, %vm2697_vm14  ;;  %v2625_v58 = vand.u32 2147483647, %v5960_v10  ;;  %v2613_v5 = vor.u32 1.1754944e-38, %v2612_v55 }
 0x3fb   : > { %2760 = vst [vmem:[%s5895_s20 + $0x8] sm:$0xff] %v2752_v44  ;;  %v2693_v17 = vsub.f32 1.0, %v2692_v11  ;;  %v2602_v21 = vmul.f32 %v5967_v15, %v5953_v0  ;;  %v4165_v26 = vpop.eup %4164  ;;  %v2689_v34 = vsel %vm2686_vm0, %v2688_v38, %v2684_v27  ;;  %vm2607_vm5 = vweird.f32 %v5967_v15 }
 0x3fc   : > { %4168 = vrcp.f32 %v5971_v18  ;;  %v5989_v42 = vadd.f32 1.0, %v4165_v26  ;;  %vm6007_vm7 = vmor %vm2606_vm4, %vm2607_vm5  ;;  %v2628_v40 = vor.u32 1.1754944e-38, %v2627_v56  ;;  %vm2611_vm10 = vcmp.eq.f32.partialorder %v2610_v29, 8.507059e+37 }
 0x3fd   : > { %v2694_v35 = vmul.f32 %v4159_v53, %v2693_v17  ;;  %v2603_v28 = vsub.f32 1.0, %v2602_v21  ;;  %v4167_v33 = vpop.eup %4166  ;;  %vm2626_vm11 = vcmp.eq.f32.partialorder %v2625_v58, 8.507059e+37  ;;  %vm2711_vm12 = vweird.f32 %v5971_v18 }
 0x3fe   : > { %v2617_v45 = vmul.f32 %v4167_v33, %v5960_v10  ;;  %4170 = vrcp.f32 %v5989_v42  ;;  %vm2622_vm6 = vweird.f32 %v4167_v33  ;;  %v2715_v10 = vand.u32 2147483647, %v5971_v18 }
 0x3ff   : > { %v2695_v32 = vadd.f32 %v4159_v53, %v2694_v35  ;;  %v2604_v41 = vmul.f32 %v5967_v15, %v2603_v28  ;;  %vm2623_vm9 = vmor %vm2621_vm8, %vm2622_vm6  ;;  %v2717_v11 = vand.u32 2147483648, %v5971_v18  ;;  %v2732_v59 = vand.u32 2147483648, %v5989_v42 }
 0x400   : > { %v2466_v23 = vpop.f32.mrf.mxu1  ;;  %v2480_v25 = vpop.f32.mrf.mxu2  ;;  %v2618_v54 = vsub.f32 1.0, %v2617_v45  ;;  %vm2726_vm0 = vweird.f32 %v5989_v42  ;;  %vm2762_vm8 = vcmask 125952  }
 0x401   : > { %v2467_v30 = vadd.f32 %v2466_v23, %v1705_v13  ;;  %v2699_v43 = vsel %vm2698_vm2, %v4159_v53, %v2695_v32  ;;  %v2605_v52 = vadd.f32 %v5967_v15, %v2604_v41  ;;  %v2718_v19 = vor.u32 1.1754944e-38, %v2717_v11 }
 0x402   : > { %v2704_v49 = vsel %vm2701_vm3, %v2703_v39, %v2699_v43  ;;  %v5994_v50 = vpop.eup %4168  ;;  %v2619_v31 = vmul.f32 %v4167_v33, %v2618_v54  ;;  %v2733_v20 = vor.u32 1.1754944e-38, %v2732_v59  ;;  %vm2716_vm2 = vcmp.eq.f32.partialorder %v2715_v10, 8.507059e+37 }
 0x403   : > { %v2481_v46 = vadd.f32 %v2480_v25, %v2467_v30  ;;  %v2756_v51 = vpack.c.bf16 %v2704_v49, %v2689_v34  ;;  %v2707_v22 = vmul.f32 %v5994_v50, %v5971_v18  ;;  %v2609_v62 = vsel %vm6007_vm7, %v5967_v15, %v2605_v52 }
 0x404   : > { %v2620_v1 = vadd.f32 %v4167_v33, %v2619_v31  ;;  %v4171_v3 = vpop.eup %4170  ;;  %v2614_v9 = vsel %vm2611_vm10, %v2613_v5, %v2609_v62  ;;  %vm2712_vm13 = vweird.f32 %v5994_v50 }
 0x405   : > { %v3833_v57 = vmul.f32 -1.442695, %v2481_v46  ;;  %2765 = vst [vmem:[%s5895_s20 + $0x24] sm:$0xff] %v2756_v51  ;;  %v2708_v61 = vsub.f32 1.0, %v2707_v22  ;;  %v2722_v8 = vmul.f32 %v4171_v3, %v5989_v42  ;;  %vm2727_vm14 = vweird.f32 %v4171_v3  ;;  %vm2713_vm15 = vmor %vm2711_vm12, %vm2712_vm13 }
 0x406   : > { %v2624_v7 = vsel %vm2623_vm9, %v4167_v33, %v2620_v1  ;;  %vm2728_vm1 = vmor %vm2726_vm0, %vm2727_vm14 }
 0x407   : > { %4172 = vpow2.f32 %v3833_v57  ;;  %v2709_v0 = vmul.f32 %v5994_v50, %v2708_v61  ;;  %v2629_v4 = vsel %vm2626_vm11, %v2628_v40, %v2624_v7  ;;  %v2723_v53 = vsub.f32 1.0, %v2722_v8 }
 0x408   : > { %v2468_v47 = vpop.f32.mrf.mxu1  ;;  %v2482_v2 = vpop.f32.mrf.mxu2  ;;  %v2753_v48 = vpack.c.bf16 %v2629_v4, %v2614_v9 }
 0x409   : > { %v2469_v36 = vadd.f32 %v2468_v47, %v1705_v13  ;;  %v2710_v37 = vadd.f32 %v5994_v50, %v2709_v0  ;;  %v2724_v12 = vmul.f32 %v4171_v3, %v2723_v53  ;;  %v2730_v13 = vand.u32 2147483647, %v5989_v42 }
 0x40a   : > { %2761 = vst [vmem:[%s5895_s20 + $0x10] sm:$0xff] %v2753_v48 }
 0x40b   : > { %v2483_v6 = vadd.f32 %v2482_v2, %v2469_v36  ;;  %v2714_v16 = vsel %vm2713_vm15, %v5994_v50, %v2710_v37  ;;  %v2725_v17 = vadd.f32 %v4171_v3, %v2724_v12  ;;  %vm2731_vm3 = vcmp.eq.f32.partialorder %v2730_v13, 8.507059e+37 }
 0x40c   : > { %v2719_v35 = vsel %vm2716_vm2, %v2718_v19, %v2714_v16 }
 0x40d   : > { %v3840_v63 = vmul.f32 -1.442695, %v2483_v6  ;;  %v4173_v44 = vpop.eup %4172  ;;  %v2729_v21 = vsel %vm2728_vm1, %v4171_v3, %v2725_v17 }
 0x40e   : > { %v2533_v15 = vadd.f32 1.0, %v4173_v44  ;;  %v2734_v24 = vsel %vm2731_vm3, %v2733_v20, %v2729_v21 }
 0x40f   : > { %4174 = vpow2.f32 %v3840_v63  ;;  %v2757_v25 = vpack.c.bf16 %v2734_v24, %v2719_v35 }
 0x410   : > { %4176 = vrcp.f32 %v2533_v15  ;;  %v2642_v26 = vand.u32 2147483648, %v2533_v15  ;;  %v2640_v32 = vand.u32 2147483647, %v2533_v15  ;;  %vm2636_vm5 = vweird.f32 %v2533_v15 }
 0x411   : > { %2766 = vst [vmem:[%s5895_s20 + $0x2c] sm:$0xff] %v2757_v25 }
 0x412   : > { %v2643_v41 = vor.u32 1.1754944e-38, %v2642_v26  ;;  %vm2641_vm7 = vcmp.eq.f32.partialorder %v2640_v32, 8.507059e+37 }
 0x415   : > { %v4175_v23 = vpop.eup %4174 }
 0x416   : > { %v2540_v18 = vadd.f32 1.0, %v4175_v23  ;;  %v4177_v14 = vpop.eup %4176 }
 0x417   : > { %v2632_v28 = vmul.f32 %v4177_v14, %v2533_v15  ;;  %vm2637_vm4 = vweird.f32 %v4177_v14 }
 0x418   : > { %4178 = vrcp.f32 %v2540_v18  ;;  %vm2638_vm6 = vmor %vm2636_vm5, %vm2637_vm4  ;;  %v2747_v46 = vand.u32 2147483648, %v2540_v18  ;;  %v2745_v50 = vand.u32 2147483647, %v2540_v18  ;;  %vm2741_vm10 = vweird.f32 %v2540_v18 }
 0x419   : > { %v2633_v30 = vsub.f32 1.0, %v2632_v28 }
 0x41a   : > { %v2748_v52 = vor.u32 1.1754944e-38, %v2747_v46  ;;  %vm2746_vm12 = vcmp.eq.f32.partialorder %v2745_v50, 8.507059e+37 }
 0x41b   : > { %v2634_v27 = vmul.f32 %v4177_v14, %v2633_v30 }
 0x41d   : > { %v2635_v38 = vadd.f32 %v4177_v14, %v2634_v27 }
 0x41e   : > { %v4179_v33 = vpop.eup %4178 }
 0x41f   : > { %v2737_v39 = vmul.f32 %v4179_v33, %v2540_v18  ;;  %v2639_v42 = vsel %vm2638_vm6, %v4177_v14, %v2635_v38  ;;  %vm2742_vm9 = vweird.f32 %v4179_v33 }
 0x420   : > { %v2644_v45 = vsel %vm2641_vm7, %v2643_v41, %v2639_v42  ;;  %vm2743_vm11 = vmor %vm2741_vm10, %vm2742_vm9 }
 0x421   : > { %v2738_v43 = vsub.f32 1.0, %v2737_v39  ;;  %v2754_v34 = vpack.c.bf16 %v2644_v45, %v2644_v45 }
 0x423   : > { %v2739_v49 = vmul.f32 %v4179_v33, %v2738_v43  ;;  %2763 = vst.msk [vmem:[%s5895_s20 + $0x18] sm:$0xf] %vm2762_vm8, %v2754_v34 }
 0x425   : > { %v2740_v51 = vadd.f32 %v4179_v33, %v2739_v49 }
 0x427   : > { %v2744_v54 = vsel %vm2743_vm11, %v4179_v33, %v2740_v51 }
 0x428   : > { %v2749_v55 = vsel %vm2746_vm12, %v2748_v52, %v2744_v54 }
 0x429   : > { %v2758_v56 = vpack.c.bf16 %v2749_v55, %v2749_v55 }
 0x42b   : > { %2767 = vst.msk [vmem:[%s5895_s20 + $0x34] sm:$0xf] %vm2762_vm8, %v2758_v56 }
 0x42c   : > { %4207 = shalt.err (!%p4204_p3)
}
 0x42d   : > { %s4246_s30 = smov 448   ;;  %s4247_s20 = smov 28  }
 0x42e   : > { %4075 = dma.vmem_to_hbm [thread:$0]  (%p4356_p5), %s2807_s29, 896, %s2809_s21, %s2789_s23, %s4246_s30, %s4246_s30, %s4247_s20  }
 0x42f PF: > { %s6112_s14 = sld [smem:[#allocation5_spill]]  ;;  %p4081_p4 = scmp.ge.s32.totalorder %s4242_s28, 2 }
 0x431   : > { %p4078_p7 = pnand %p4081_p4, %p4360_p6 }
 0x433   : > { %p4079_p8 = pneg %p4078_p7 }
 0x435   : > { %s2831_s24 = sand.u32 1, %s6112_s14  }
 0x436   : > { %s2832_s17 = scalar_lea.sflag [#allocation3], %s2831_s24 }
 0x437   : > { %4225 = dma.done.wait (%p4079_p8), %s2832_s17, 896  }
 0x438   : > { %4227 = vsyncadd (%p4079_p8), %s2832_s17, 4294966400  ;;  %s6114_s28 = sld [smem:[#allocation7_spill]]  ;;  %s6117_s25 = smov %s4234_s26 }
 0x439   : > { %s6115_s22 = sld [smem:[#allocation6_spill]] }
 0x43a   : > { %s6116_s27 = sld [smem:[#allocation8_spill]] }
 0x43e   : > { %p24_p9 = scmp.ge.s32.totalorder %s6114_s28, 4  }
 0x43f   : > { %s6118_s26 = smov %s6115_s22 }
 0x440   :  { %26 = sbr.rel (!%p24_p9) target bundleno = 3 (0x3), region = 118 }
 0x445   :  { %2838 = vsyncpa [#allocation3], 1 }
 0x446   :  { %2840 = vsyncpa [#allocation3 + $0x1], 1 }

</bundles_post_ra>
